<compile_context>
chip_gen: v7x
topology: tpu7x:2x2x1
jax: 0.10.0
libtpu: 0.0.40
codegen_flags: <defaults>
</compile_context>

<pallas_src>
import functools

import jax
import jax.numpy as jnp
from jax.experimental import pallas as pl
from jax.experimental.pallas import tpu as pltpu


# ---------------------------------------------------------------------------
# small helper: pad the (last) token axis to a lane-dense tile multiple
# ---------------------------------------------------------------------------
def _pad_token_axis(x, cap):
    """Pad last axis to a multiple of 128 and pick the largest tile <= cap that
    divides the padded length. Returns (x_padded, tile, padded_len)."""
    m = x.shape[-1]
    m_pad = max(128, -(-m // 128) * 128)
    tile = min(m_pad, cap)
    m_pad = -(-m_pad // tile) * tile
    if m_pad != m:
        pad = [(0, 0)] * (x.ndim - 1) + [(0, m_pad - m)]
        x = jnp.pad(x, pad)
    return x, tile, m_pad


# ---------------------------------------------------------------------------
# Fused encoder + LFQ kernel (channel-major: channels x tokens, batched grid)
# ---------------------------------------------------------------------------
def _enc_lfq_kernel(x_ref, w1_ref, b1_ref, w2_ref, b2_ref, pow2_ref,
                    zq_ref, idx_ref, stats_ref, *, inv_temp, valid_tokens, tm):
    # ---- encoder: two pointwise (1x1x1 conv) layers, intermediate stays on-chip
    h = jnp.dot(w1_ref[...], x_ref[...], preferred_element_type=jnp.float32)
    h = jnp.maximum(h + b1_ref[...], 0.0)                        # (D, tm)
    z = jnp.dot(w2_ref[...], h, preferred_element_type=jnp.float32) + b2_ref[...]

    # ---- LFQ sign quantization, emitted f32 in final layout ------------------
    # TODO(synk): z == 0 maps to -1; verify against the reference sign convention.
    zq = jnp.where(z > 0, 1.0, -1.0)                             # (D, tm), +/-1
    zq_ref[...] = zq

    # bit-packed code index via a tiny (1,D)x(D,tm) MXU dot (lane-dense (1,tm))
    bits = 0.5 * (zq + 1.0)                                      # {0, 1}
    idx_ref[...] = jnp.dot(pow2_ref[...], bits,
                           preferred_element_type=jnp.float32).astype(jnp.int32)

    # ---- LFQ statistics as per-block partial sums ----------------------------
    # TODO(synk): per-bit logits a = inv_temp*z (distance-based LFQ uses 4*inv_temp*z).
    a = inv_temp * z
    e = jnp.exp(-jnp.abs(a))                                     # shared EUP exp
    r = pl.reciprocal(1.0 + e, approx=True)
    p = jnp.where(a >= 0, r, e * r)                              # sigmoid(a)
    ent = (jnp.maximum(a, 0.0) + jnp.log1p(e)) - a * p           # H(sigmoid(a))
    sq = (zq - z) ** 2                                           # commitment stat

    if valid_tokens is not None:                                 # mask padded tail
        col = jax.lax.broadcasted_iota(jnp.int32, z.shape, 1) + pl.program_id(1) * tm
        mask = (col < valid_tokens).astype(jnp.float32)
        ent = ent * mask
        sq = sq * mask
        p = p * mask

    ent_sum = jnp.sum(ent)                                       # scalar
    sq_sum = jnp.sum(sq)                                         # scalar
    p_sum = jnp.sum(p, axis=1, keepdims=True)                    # (D, 1)

    # pack [per-channel p_sum | sq | ent] into one lane-dense (8, 128) slab
    lane = jax.lax.broadcasted_iota(jnp.int32, (8, 128), 1)
    sub = jax.lax.broadcasted_iota(jnp.int32, (8, 128), 0)
    slab = jnp.where(lane == 0, p_sum, 0.0)                      # lane 0: p_sum col
    slab = jnp.where((lane == 1) & (sub == 0), sq_sum, slab)     # (0,1): sq
    slab = jnp.where((lane == 2) & (sub == 0), ent_sum, slab)    # (0,2): ent
    stats_ref[...] = slab


def encode_and_quantize(x_b, w1_t, b1, w2_t, b2, *, inv_temp=4.0, tm_cap=32768):
    """x_b: (NB, C_in, THW) batched channel-major tokens.

    Returns (zq (NB, D, THW_pad) f32, idx (NB, 1, THW_pad) i32,
             stats (8, NB*nbj*128) f32, THW_pad)."""
    NB, C_in, THW = x_b.shape
    D = w1_t.shape[0]
    assert D == 8, "stats-slab packing assumes codebook_dim == 8"

    x_b, tm, thw_pad = _pad_token_axis(x_b, tm_cap)
    nbj = thw_pad // tm
    valid = None if thw_pad == THW else THW

    pow2 = (2.0 ** jnp.arange(D, dtype=jnp.float32)).reshape(1, D)
    kernel = functools.partial(_enc_lfq_kernel, inv_temp=inv_temp,
                               valid_tokens=valid, tm=tm)
    zq, idx, stats = pl.pallas_call(
        kernel,
        out_shape=(
            jax.ShapeDtypeStruct((NB, D, thw_pad), jnp.float32),
            jax.ShapeDtypeStruct((NB, 1, thw_pad), jnp.int32),
            jax.ShapeDtypeStruct((8, NB * nbj * 128), jnp.float32),
        ),
        grid=(NB, nbj),
        in_specs=[
            pl.BlockSpec((None, C_in, tm), lambda b, j: (b, 0, j)),
            pl.BlockSpec((D, C_in), lambda b, j: (0, 0)),
            pl.BlockSpec((D, 1), lambda b, j: (0, 0)),
            pl.BlockSpec((D, D), lambda b, j: (0, 0)),
            pl.BlockSpec((D, 1), lambda b, j: (0, 0)),
            pl.BlockSpec((1, D), lambda b, j: (0, 0)),
        ],
        out_specs=(
            pl.BlockSpec((None, D, tm), lambda b, j: (b, 0, j)),
            pl.BlockSpec((None, 1, tm), lambda b, j: (b, 0, j)),
            pl.BlockSpec((8, 128), lambda b, j: (0, b * nbj + j)),
        ),
        compiler_params=pltpu.CompilerParams(
            dimension_semantics=("parallel", "parallel")),
    )(x_b, w1_t, b1, w2_t, b2, pow2)
    return zq, idx, stats, thw_pad


# ---------------------------------------------------------------------------
# Fused 2-layer MLP classifier heads (channel-major)
# ---------------------------------------------------------------------------
def _mlp2_kernel(x_ref, w1_ref, b1_ref, w2_ref, b2_ref, o_ref):
    h = jnp.dot(w1_ref[...], x_ref[...], preferred_element_type=jnp.float32)
    h = jnp.maximum(h + b1_ref[...], 0.0)
    o = jnp.dot(w2_ref[...], h, preferred_element_type=jnp.float32) + b2_ref[...]
    o_ref[...] = o.astype(o_ref.dtype)


def mlp2_joint(x_cm, w1_t, b1, w2_t, b2, *, tn_cap=8192):
    """x_cm: (K, M) channel-major tokens -> (NO, M)."""
    K, M = x_cm.shape
    H1, NO = w1_t.shape[0], w2_t.shape[0]
    x_cm, tn, m_pad = _pad_token_axis(x_cm, tn_cap)
    out = pl.pallas_call(
        _mlp2_kernel,
        out_shape=jax.ShapeDtypeStruct((NO, m_pad), jnp.float32),
        grid=(m_pad // tn,),
        in_specs=[
            pl.BlockSpec((K, tn), lambda j: (0, j)),
            pl.BlockSpec((H1, K), lambda j: (0, 0)),
            pl.BlockSpec((H1, 1), lambda j: (0, 0)),
            pl.BlockSpec((NO, H1), lambda j: (0, 0)),
            pl.BlockSpec((NO, 1), lambda j: (0, 0)),
        ],
        out_specs=pl.BlockSpec((NO, tn), lambda j: (0, j)),
        compiler_params=pltpu.CompilerParams(dimension_semantics=("parallel",)),
    )(x_cm, w1_t, b1, w2_t, b2)
    return out[:, :M]


def mlp2_heads(x_cm, w1_t, b1, w2_t, b2, *, tn_cap=8192):
    """x_cm: (V, K, M) -> (V, NO, M); all V heads in one pallas_call (grid over V)."""
    V, K, M = x_cm.shape
    H1, NO = w1_t.shape[1], w2_t.shape[1]
    x_cm, tn, m_pad = _pad_token_axis(x_cm, tn_cap)
    out = pl.pallas_call(
        _mlp2_kernel,
        out_shape=jax.ShapeDtypeStruct((V, NO, m_pad), jnp.float32),
        grid=(V, m_pad // tn),
        in_specs=[
            pl.BlockSpec((None, K, tn), lambda v, j: (v, 0, j)),
            pl.BlockSpec((None, H1, K), lambda v, j: (v, 0, 0)),
            pl.BlockSpec((None, H1, 1), lambda v, j: (v, 0, 0)),
            pl.BlockSpec((None, NO, H1), lambda v, j: (v, 0, 0)),
            pl.BlockSpec((None, NO, 1), lambda v, j: (v, 0, 0)),
        ],
        out_specs=pl.BlockSpec((None, NO, tn), lambda v, j: (v, 0, j)),
        compiler_params=pltpu.CompilerParams(
            dimension_semantics=("parallel", "parallel")),
    )(x_cm, w1_t, b1, w2_t, b2)
    return out[:, :, :M]


# ---------------------------------------------------------------------------
# VQ_model forward (glue in plain JAX, hot paths in the kernels above)
# ---------------------------------------------------------------------------
LAMBDA_ENTROPY = 0.1       # config.lambda_entropy
DIVERSITY_GAMMA = 1.0      # config.diversity_gamma
LAMBDA_COMMITMENT = 0.25   # config.lambda_commitment


def vq_model_forward(params, x_d):
    """x_d: (N, V, C_in, T, H, W) float32 — matches the PyTorch forward signature."""
    N, V, C_in, T, H, W = x_d.shape
    D = params["enc_w1"].shape[1]          # en_embed_dim == codebook_dim
    CLS = params["cls_joint_w1"].shape[1]
    NCLS = params["cls_joint_w2"].shape[1]
    NB = N * V
    THW = T * H * W
    M = NB * THW                           # total token count

    # ---- encoder + LFQ (single fused Pallas kernel, batched grid) -------------
    # TODO(synk): CNN_3D/Swin_3D/Mamba encoder sources not provided; approximated
    # with a shared 2-layer pointwise (1x1x1) conv stack with ReLU.
    x_b = x_d.reshape(NB, C_in, THW)       # zero-copy: no wrapper transpose
    zq_b, idx_b, stats, thw_pad = encode_and_quantize(
        x_b,
        params["enc_w1"].T, params["enc_b1"].reshape(D, 1),
        params["enc_w2"].T, params["enc_b2"].reshape(D, 1))

    # reduce per-block partial statistics -> LFQ loss
    G = stats.shape[1] // 128
    st = stats.reshape(8, G, 128)
    p_sum = jnp.sum(st[:, :, 0], axis=1)                 # (D,)
    sq_sum = jnp.sum(st[0, :, 1])
    ent_sum = jnp.sum(st[0, :, 2])
    commit_loss = sq_sum / (M * D)
    per_sample_entropy = ent_sum / M
    q = p_sum / M
    eps = 1e-6
    batch_entropy = -jnp.sum(q * jnp.log(q + eps) + (1.0 - q) * jnp.log(1.0 - q + eps))
    # TODO(synk): full 2^dim-codebook entropy replaced by factorized per-bit entropy.
    entropy_aux = per_sample_entropy - DIVERSITY_GAMMA * batch_entropy
    loss_z_q = LAMBDA_ENTROPY * entropy_aux + LAMBDA_COMMITMENT * commit_loss

    # ---- kernel outputs are already in final layout (only tail-slice if padded)
    if thw_pad != THW:
        zq_b = zq_b[:, :, :THW]
        idx_b = idx_b[:, :, :THW]
    z_q = zq_b.reshape(N, V, D, T, H, W)                 # (N, V, C, T, H, W) f32
    anomaly = idx_b.reshape(N, V, T, H, W)               # int32 code indices

    # ---- classifier (2 fused Pallas calls) ------------------------------------
    # TODO(synk): CNN_3D classifier source not provided; approximated with a
    # temporal mean followed by a fused 2-layer pointwise head (joint + per-var).
    # Mean over T on the compact kernel layout BEFORE any transpose.
    zq_mean = jnp.mean(zq_b.reshape(NB, D, T, H * W), axis=2)        # (NB, D, HW)
    x_heads = jnp.transpose(zq_mean.reshape(N, V, D, H * W),
                            (1, 2, 0, 3)).reshape(V, D, N * H * W)   # (V, D, N*HW)
    x_joint = x_heads.reshape(V * D, N * H * W)                      # (V*D, N*HW)

    jh = mlp2_joint(
        x_joint,
        params["cls_joint_w1"].T, params["cls_joint_b1"].reshape(CLS, 1),
        params["cls_joint_w2"].T, params["cls_joint_b2"].reshape(NCLS, 1))
    z_out = jnp.transpose(jh.reshape(NCLS, N, H, W), (1, 0, 2, 3))   # (N, n_classes, H, W)

    yh = mlp2_heads(
        x_heads,
        jnp.transpose(params["cls_head_w1"], (0, 2, 1)),
        params["cls_head_b1"][..., None],
        jnp.transpose(params["cls_head_w2"], (0, 2, 1)),
        params["cls_head_b2"][..., None])
    yh = jnp.transpose(yh.reshape(V, NCLS, N, H, W), (0, 2, 1, 3, 4))
    y = [yh[v] for v in range(V)]

    return z_out, y, anomaly, z_q, loss_z_q.reshape(1)


# ---------------------------------------------------------------------------
# Deterministic parameter init (mimics torch init: normal(mean=0.02, std=0.02),
# zero biases — _init_weights with init_type='normal', gain=0.02).
# ---------------------------------------------------------------------------
def _init_w(key, shape):
    return 0.02 + 0.02 * jax.random.normal(key, shape, dtype=jnp.float32)


def make_params(key, *, C_in, V, D, CLS, NCLS):
    ks = jax.random.split(key, 8)
    return {
        "enc_w1": _init_w(ks[0], (C_in, D)), "enc_b1": jnp.zeros((D,), jnp.float32),
        "enc_w2": _init_w(ks[1], (D, D)),    "enc_b2": jnp.zeros((D,), jnp.float32),
        "cls_joint_w1": _init_w(ks[2], (V * D, CLS)),
        "cls_joint_b1": jnp.zeros((CLS,), jnp.float32),
        "cls_joint_w2": _init_w(ks[3], (CLS, NCLS)),
        "cls_joint_b2": jnp.zeros((NCLS,), jnp.float32),
        "cls_head_w1": _init_w(ks[4], (V, D, CLS)),
        "cls_head_b1": jnp.zeros((V, CLS), jnp.float32),
        "cls_head_w2": _init_w(ks[5], (V, CLS, NCLS)),
        "cls_head_b2": jnp.zeros((V, NCLS), jnp.float32),
    }


if __name__ == "__main__":
    # small shapes consistent with the forward: x_d is [N, V, C_in, T, H, W]
    N, V, C_in, T, H, W = 2, 2, 3, 4, 16, 16
    D = 8        # en_embed_dim == codebook_dim (codebook_size = 2**D = 256)
    CLS = 16     # cls_dim
    NCLS = 4     # number of classes

    root = jax.random.PRNGKey(0)
    k_data, k_params = jax.random.split(root)
    x_d = jax.random.normal(k_data, (N, V, C_in, T, H, W), dtype=jnp.float32)
    params = make_params(k_params, C_in=C_in, V=V, D=D, CLS=CLS, NCLS=NCLS)

    fwd = jax.jit(vq_model_forward)
    z, y, anomaly, z_q, loss_z_q = fwd(params, x_d)
    jax.block_until_ready((z, y, anomaly, z_q, loss_z_q))

    # basic shape sanity (mirrors the documented PyTorch return shapes)
    assert z.shape == (N, NCLS, H, W)
    assert len(y) == V and all(t.shape == (N, NCLS, H, W) for t in y)
    assert anomaly.shape == (N, V, T, H, W)
    assert z_q.shape == (N, V, D, T, H, W)
    assert loss_z_q.shape == (1,)
    assert bool(jnp.all(jnp.abs(z_q) == 1.0))
    assert bool(jnp.all((anomaly >= 0) & (anomaly < 2 ** D)))

    print("KERNEL_OK")
</pallas_src>

<mosaic_0001>
module attributes {stable_mosaic.version = 11 : i64} {
  func.func @_enc_lfq_kernel(%arg0: i32, %arg1: i32, %arg2: memref<1x3x1024xf32, #tpu.memory_space<vmem>>, %arg3: memref<8x3xf32, #tpu.memory_space<vmem>>, %arg4: memref<8x1xf32, #tpu.memory_space<vmem>>, %arg5: memref<8x8xf32, #tpu.memory_space<vmem>>, %arg6: memref<8x1xf32, #tpu.memory_space<vmem>>, %arg7: memref<1x8xf32, #tpu.memory_space<vmem>>, %arg8: memref<1x8x1024xf32, #tpu.memory_space<vmem>>, %arg9: memref<1x1x1024xi32, #tpu.memory_space<vmem>>, %arg10: memref<8x128xf32, #tpu.memory_space<vmem>>) attributes {dimension_semantics = [#tpu.dimension_semantics<parallel>, #tpu.dimension_semantics<parallel>], iteration_bounds = array<i64: 4, 1>, scalar_prefetch = 0 : i64, scratch_operands = 0 : i64, tpu.core_type = #tpu.core_type<tc>, window_params = [{transform_indices = @transform_0, window_bounds = array<i64: 1, 3, 1024>}, {pipeline_mode = #tpu.pipeline_mode<synchronous>, transform_indices = @transform_1, window_bounds = array<i64: 8, 3>}, {pipeline_mode = #tpu.pipeline_mode<synchronous>, transform_indices = @transform_2, window_bounds = array<i64: 8, 1>}, {pipeline_mode = #tpu.pipeline_mode<synchronous>, transform_indices = @transform_3, window_bounds = array<i64: 8, 8>}, {pipeline_mode = #tpu.pipeline_mode<synchronous>, transform_indices = @transform_4, window_bounds = array<i64: 8, 1>}, {pipeline_mode = #tpu.pipeline_mode<synchronous>, transform_indices = @transform_5, window_bounds = array<i64: 1, 8>}, {transform_indices = @transform_6, window_bounds = array<i64: 1, 8, 1024>}, {transform_indices = @transform_7, window_bounds = array<i64: 1, 1, 1024>}, {transform_indices = @transform_8, window_bounds = array<i64: 8, 128>}]} {
    %c0 = arith.constant 0 : index
    %c0_0 = arith.constant 0 : index
    %0 = vector.load %arg3[%c0, %c0_0] : memref<8x3xf32, #tpu.memory_space<vmem>>, vector<8x3xf32>
    %c0_1 = arith.constant 0 : index
    %c0_2 = arith.constant 0 : index
    %c0_3 = arith.constant 0 : index
    %1 = vector.load %arg2[%c0_1, %c0_2, %c0_3] : memref<1x3x1024xf32, #tpu.memory_space<vmem>>, vector<1x3x1024xf32>
    %2 = vector.shape_cast %1 : vector<1x3x1024xf32> to vector<3x1024xf32>
    %cst = arith.constant dense<0.000000e+00> : vector<8x1024xf32>
    %3 = tpu.matmul %0, %2, %cst {dimension_numbers = #tpu.dot_dimension_numbers<[1], [0], [0], [1], [0, 0, 1, 1], [], []>} : vector<8x3xf32>, vector<3x1024xf32>, vector<8x1024xf32> -> vector<8x1024xf32>
    %c0_4 = arith.constant 0 : index
    %c0_5 = arith.constant 0 : index
    %4 = vector.load %arg4[%c0_4, %c0_5] : memref<8x1xf32, #tpu.memory_space<vmem>>, vector<8x1xf32>
    %5 = vector.broadcast %4 : vector<8x1xf32> to vector<8x1024xf32>
    %6 = arith.addf %3, %5 : vector<8x1024xf32>
    %cst_6 = arith.constant 0.000000e+00 : f32
    %7 = vector.broadcast %cst_6 : f32 to vector<8x1024xf32>
    %8 = arith.maximumf %6, %7 : vector<8x1024xf32>
    %c0_7 = arith.constant 0 : index
    %c0_8 = arith.constant 0 : index
    %9 = vector.load %arg5[%c0_7, %c0_8] : memref<8x8xf32, #tpu.memory_space<vmem>>, vector<8x8xf32>
    %cst_9 = arith.constant dense<0.000000e+00> : vector<8x1024xf32>
    %10 = tpu.matmul %9, %8, %cst_9 {dimension_numbers = #tpu.dot_dimension_numbers<[1], [0], [0], [1], [0, 0, 1, 1], [], []>} : vector<8x8xf32>, vector<8x1024xf32>, vector<8x1024xf32> -> vector<8x1024xf32>
    %c0_10 = arith.constant 0 : index
    %c0_11 = arith.constant 0 : index
    %11 = vector.load %arg6[%c0_10, %c0_11] : memref<8x1xf32, #tpu.memory_space<vmem>>, vector<8x1xf32>
    %12 = vector.broadcast %11 : vector<8x1xf32> to vector<8x1024xf32>
    %13 = arith.addf %10, %12 : vector<8x1024xf32>
    %cst_12 = arith.constant 0.000000e+00 : f32
    %14 = vector.broadcast %cst_12 : f32 to vector<8x1024xf32>
    %15 = arith.cmpf ogt, %13, %14 : vector<8x1024xf32>
    %cst_13 = arith.constant 1.000000e+00 : f32
    %cst_14 = arith.constant -1.000000e+00 : f32
    %16 = vector.broadcast %cst_13 : f32 to vector<8x1024xf32>
    %17 = vector.broadcast %cst_14 : f32 to vector<8x1024xf32>
    %18 = arith.select %15, %16, %17 : vector<8x1024xi1>, vector<8x1024xf32>
    %c0_15 = arith.constant 0 : index
    %c0_16 = arith.constant 0 : index
    %c0_17 = arith.constant 0 : index
    %19 = vector.load %arg8[%c0_15, %c0_16, %c0_17] : memref<1x8x1024xf32, #tpu.memory_space<vmem>>, vector<1x8x1024xf32>
    %20 = vector.shape_cast %19 : vector<1x8x1024xf32> to vector<8x1024xf32>
    %21 = vector.shape_cast %18 : vector<8x1024xf32> to vector<1x8x1024xf32>
    tpu.vector_store %arg8[%c0_15, %c0_16, %c0_17], %21 {strides = array<i32>} : memref<1x8x1024xf32, #tpu.memory_space<vmem>>, vector<1x8x1024xf32>,
    %cst_18 = arith.constant 1.000000e+00 : f32
    %22 = vector.broadcast %cst_18 : f32 to vector<8x1024xf32>
    %23 = arith.addf %18, %22 : vector<8x1024xf32>
    %cst_19 = arith.constant 5.000000e-01 : f32
    %24 = vector.broadcast %cst_19 : f32 to vector<8x1024xf32>
    %25 = arith.mulf %24, %23 : vector<8x1024xf32>
    %c0_20 = arith.constant 0 : index
    %c0_21 = arith.constant 0 : index
    %26 = vector.load %arg7[%c0_20, %c0_21] : memref<1x8xf32, #tpu.memory_space<vmem>>, vector<1x8xf32>
    %cst_22 = arith.constant dense<0.000000e+00> : vector<1x1024xf32>
    %27 = tpu.matmul %26, %25, %cst_22 {dimension_numbers = #tpu.dot_dimension_numbers<[1], [0], [0], [1], [0, 0, 1, 1], [], []>} : vector<1x8xf32>, vector<8x1024xf32>, vector<1x1024xf32> -> vector<1x1024xf32>
    %28 = arith.fptosi %27 : vector<1x1024xf32> to vector<1x1024xi32>
    %c0_23 = arith.constant 0 : index
    %c0_24 = arith.constant 0 : index
    %c0_25 = arith.constant 0 : index
    %29 = vector.load %arg9[%c0_23, %c0_24, %c0_25] : memref<1x1x1024xi32, #tpu.memory_space<vmem>>, vector<1x1x1024xi32>
    %30 = vector.shape_cast %29 : vector<1x1x1024xi32> to vector<1x1024xi32>
    %31 = vector.shape_cast %28 : vector<1x1024xi32> to vector<1x1x1024xi32>
    tpu.vector_store %arg9[%c0_23, %c0_24, %c0_25], %31 {strides = array<i32>} : memref<1x1x1024xi32, #tpu.memory_space<vmem>>, vector<1x1x1024xi32>,
    %cst_26 = arith.constant 4.000000e+00 : f32
    %32 = vector.broadcast %cst_26 : f32 to vector<8x1024xf32>
    %33 = arith.mulf %32, %13 : vector<8x1024xf32>
    %34 = math.absf %33 : vector<8x1024xf32>
    %cst_27 = arith.constant 0.000000e+00 : f32
    %35 = vector.broadcast %cst_27 : f32 to vector<8x1024xf32>
    %36 = arith.subf %35, %34 : vector<8x1024xf32>
    %37 = math.exp %36 : vector<8x1024xf32>
    %cst_28 = arith.constant 1.000000e+00 : f32
    %38 = vector.broadcast %cst_28 : f32 to vector<8x1024xf32>
    %39 = arith.addf %38, %37 : vector<8x1024xf32>
    %40 = tpu.reciprocal %39 {approx = true} : vector<8x1024xf32> -> vector<8x1024xf32>
    %cst_29 = arith.constant 0.000000e+00 : f32
    %41 = vector.broadcast %cst_29 : f32 to vector<8x1024xf32>
    %42 = arith.cmpf oge, %33, %41 : vector<8x1024xf32>
    %43 = arith.mulf %37, %40 : vector<8x1024xf32>
    %44 = arith.select %42, %40, %43 : vector<8x1024xi1>, vector<8x1024xf32>
    %cst_30 = arith.constant 0.000000e+00 : f32
    %45 = vector.broadcast %cst_30 : f32 to vector<8x1024xf32>
    %46 = arith.maximumf %33, %45 : vector<8x1024xf32>
    %47 = math.log1p %37 : vector<8x1024xf32>
    %48 = arith.addf %46, %47 : vector<8x1024xf32>
    %49 = arith.mulf %33, %44 : vector<8x1024xf32>
    %50 = arith.subf %48, %49 : vector<8x1024xf32>
    %51 = arith.subf %18, %13 : vector<8x1024xf32>
    %52 = arith.mulf %51, %51 : vector<8x1024xf32>
    %53 = vector.shape_cast %50 : vector<8x1024xf32> to vector<1x8x1024xf32>
    %cst_31 = arith.constant dense<0.000000e+00> : vector<1xf32>
    %54 = vector.multi_reduction <add>, %53, %cst_31 [1, 2] : vector<1x8x1024xf32> to vector<1xf32>
    %55 = vector.shape_cast %54 : vector<1xf32> to vector<1x1x1xf32>
    %56 = vector.extract %55[0, 0, 0] : f32 from vector<1x1x1xf32>
    %57 = vector.shape_cast %52 : vector<8x1024xf32> to vector<1x8x1024xf32>
    %cst_32 = arith.constant dense<0.000000e+00> : vector<1xf32>
    %58 = vector.multi_reduction <add>, %57, %cst_32 [1, 2] : vector<1x8x1024xf32> to vector<1xf32>
    %59 = vector.shape_cast %58 : vector<1xf32> to vector<1x1x1xf32>
    %60 = vector.extract %59[0, 0, 0] : f32 from vector<1x1x1xf32>
    %cst_33 = arith.constant dense<0.000000e+00> : vector<8xf32>
    %61 = vector.multi_reduction <add>, %44, %cst_33 [1] : vector<8x1024xf32> to vector<8xf32>
    %62 = vector.shape_cast %61 : vector<8xf32> to vector<8x1xf32>
    %63 = tpu.iota {dimensions = array<i32: 1>} : vector<8x128xi32>
    %64 = tpu.iota {dimensions = array<i32: 0>} : vector<8x128xi32>
    %c0_i32 = arith.constant 0 : i32
    %65 = vector.broadcast %c0_i32 : i32 to vector<8x128xi32>
    %66 = arith.cmpi eq, %63, %65 : vector<8x128xi32>
    %cst_34 = arith.constant 0.000000e+00 : f32
    %67 = vector.shape_cast %62 : vector<8x1xf32> to vector<8x1xf32>
    %68 = vector.broadcast %67 : vector<8x1xf32> to vector<8x128xf32>
    %69 = vector.broadcast %cst_34 : f32 to vector<8x128xf32>
    %70 = arith.select %66, %68, %69 : vector<8x128xi1>, vector<8x128xf32>
    %c1_i32 = arith.constant 1 : i32
    %71 = vector.broadcast %c1_i32 : i32 to vector<8x128xi32>
    %72 = arith.cmpi eq, %63, %71 : vector<8x128xi32>
    %c0_i32_35 = arith.constant 0 : i32
    %73 = vector.broadcast %c0_i32_35 : i32 to vector<8x128xi32>
    %74 = arith.cmpi eq, %64, %73 : vector<8x128xi32>
    %75 = arith.andi %72, %74 : vector<8x128xi1>
    %76 = vector.broadcast %60 : f32 to vector<8x128xf32>
    %77 = arith.select %75, %76, %70 : vector<8x128xi1>, vector<8x128xf32>
    %c2_i32 = arith.constant 2 : i32
    %78 = vector.broadcast %c2_i32 : i32 to vector<8x128xi32>
    %79 = arith.cmpi eq, %63, %78 : vector<8x128xi32>
    %c0_i32_36 = arith.constant 0 : i32
    %80 = vector.broadcast %c0_i32_36 : i32 to vector<8x128xi32>
    %81 = arith.cmpi eq, %64, %80 : vector<8x128xi32>
    %82 = arith.andi %79, %81 : vector<8x128xi1>
    %83 = vector.broadcast %56 : f32 to vector<8x128xf32>
    %84 = arith.select %82, %83, %77 : vector<8x128xi1>, vector<8x128xf32>
    %c0_37 = arith.constant 0 : index
    %c0_38 = arith.constant 0 : index
    %85 = vector.load %arg10[%c0_37, %c0_38] : memref<8x128xf32, #tpu.memory_space<vmem>>, vector<8x128xf32>
    tpu.vector_store %arg10[%c0_37, %c0_38], %84 {strides = array<i32>} : memref<8x128xf32, #tpu.memory_space<vmem>>, vector<8x128xf32>,
    return
  }
  func.func @transform_0(%arg0: i32, %arg1: i32) -> (i32, i32, i32) {
    %c0_i32 = arith.constant 0 : i32
    %c0_i32_0 = arith.constant 0 : i32
    return %arg0, %c0_i32, %arg1 : i32, i32, i32
  }
  func.func @transform_1(%arg0: i32, %arg1: i32) -> (i32, i32) {
    %c0_i32 = arith.constant 0 : i32
    %c0_i32_0 = arith.constant 0 : i32
    %c0_i32_1 = arith.constant 0 : i32
    return %c0_i32, %c0_i32_0 : i32, i32
  }
  func.func @transform_2(%arg0: i32, %arg1: i32) -> (i32, i32) {
    %c0_i32 = arith.constant 0 : i32
    %c0_i32_0 = arith.constant 0 : i32
    %c0_i32_1 = arith.constant 0 : i32
    return %c0_i32, %c0_i32_0 : i32, i32
  }
  func.func @transform_3(%arg0: i32, %arg1: i32) -> (i32, i32) {
    %c0_i32 = arith.constant 0 : i32
    %c0_i32_0 = arith.constant 0 : i32
    %c0_i32_1 = arith.constant 0 : i32
    return %c0_i32, %c0_i32_0 : i32, i32
  }
  func.func @transform_4(%arg0: i32, %arg1: i32) -> (i32, i32) {
    %c0_i32 = arith.constant 0 : i32
    %c0_i32_0 = arith.constant 0 : i32
    %c0_i32_1 = arith.constant 0 : i32
    return %c0_i32, %c0_i32_0 : i32, i32
  }
  func.func @transform_5(%arg0: i32, %arg1: i32) -> (i32, i32) {
    %c0_i32 = arith.constant 0 : i32
    %c0_i32_0 = arith.constant 0 : i32
    %c0_i32_1 = arith.constant 0 : i32
    return %c0_i32, %c0_i32_0 : i32, i32
  }
  func.func @transform_6(%arg0: i32, %arg1: i32) -> (i32, i32, i32) {
    %c0_i32 = arith.constant 0 : i32
    %c0_i32_0 = arith.constant 0 : i32
    return %arg0, %c0_i32, %arg1 : i32, i32, i32
  }
  func.func @transform_7(%arg0: i32, %arg1: i32) -> (i32, i32, i32) {
    %c0_i32 = arith.constant 0 : i32
    %c0_i32_0 = arith.constant 0 : i32
    return %arg0, %c0_i32, %arg1 : i32, i32, i32
  }
  func.func @transform_8(%arg0: i32, %arg1: i32) -> (i32, i32) {
    %c1_i32 = arith.constant 1 : i32
    %0 = arith.muli %arg0, %c1_i32 : i32
    %1 = arith.addi %0, %arg1 : i32
    %c0_i32 = arith.constant 0 : i32
    %c0_i32_0 = arith.constant 0 : i32
    return %c0_i32, %1 : i32, i32
  }
}

module attributes {stable_mosaic.version = 11 : i64} {
  func.func @_mlp2_kernel(%arg0: i32, %arg1: i32, %arg2: memref<1x8x512xf32, #tpu.memory_space<vmem>>, %arg3: memref<1x16x8xf32, #tpu.memory_space<vmem>>, %arg4: memref<1x16x1xf32, #tpu.memory_space<vmem>>, %arg5: memref<1x4x16xf32, #tpu.memory_space<vmem>>, %arg6: memref<1x4x1xf32, #tpu.memory_space<vmem>>, %arg7: memref<1x4x512xf32, #tpu.memory_space<vmem>>) attributes {dimension_semantics = [#tpu.dimension_semantics<parallel>, #tpu.dimension_semantics<parallel>], iteration_bounds = array<i64: 2, 1>, scalar_prefetch = 0 : i64, scratch_operands = 0 : i64, tpu.core_type = #tpu.core_type<tc>, window_params = [{transform_indices = @transform_0, window_bounds = array<i64: 1, 8, 512>}, {transform_indices = @transform_1, window_bounds = array<i64: 1, 16, 8>}, {transform_indices = @transform_2, window_bounds = array<i64: 1, 16, 1>}, {transform_indices = @transform_3, window_bounds = array<i64: 1, 4, 16>}, {transform_indices = @transform_4, window_bounds = array<i64: 1, 4, 1>}, {transform_indices = @transform_5, window_bounds = array<i64: 1, 4, 512>}]} {
    %c0 = arith.constant 0 : index
    %c0_0 = arith.constant 0 : index
    %c0_1 = arith.constant 0 : index
    %0 = vector.load %arg3[%c0, %c0_0, %c0_1] : memref<1x16x8xf32, #tpu.memory_space<vmem>>, vector<1x16x8xf32>
    %1 = vector.shape_cast %0 : vector<1x16x8xf32> to vector<16x8xf32>
    %c0_2 = arith.constant 0 : index
    %c0_3 = arith.constant 0 : index
    %c0_4 = arith.constant 0 : index
    %2 = vector.load %arg2[%c0_2, %c0_3, %c0_4] : memref<1x8x512xf32, #tpu.memory_space<vmem>>, vector<1x8x512xf32>
    %3 = vector.shape_cast %2 : vector<1x8x512xf32> to vector<8x512xf32>
    %cst = arith.constant dense<0.000000e+00> : vector<16x512xf32>
    %4 = tpu.matmul %1, %3, %cst {dimension_numbers = #tpu.dot_dimension_numbers<[1], [0], [0], [1], [0, 0, 1, 1], [], []>} : vector<16x8xf32>, vector<8x512xf32>, vector<16x512xf32> -> vector<16x512xf32>
    %c0_5 = arith.constant 0 : index
    %c0_6 = arith.constant 0 : index
    %c0_7 = arith.constant 0 : index
    %5 = vector.load %arg4[%c0_5, %c0_6, %c0_7] : memref<1x16x1xf32, #tpu.memory_space<vmem>>, vector<1x16x1xf32>
    %6 = vector.shape_cast %5 : vector<1x16x1xf32> to vector<16x1xf32>
    %7 = vector.broadcast %6 : vector<16x1xf32> to vector<16x512xf32>
    %8 = arith.addf %4, %7 : vector<16x512xf32>
    %cst_8 = arith.constant 0.000000e+00 : f32
    %9 = vector.broadcast %cst_8 : f32 to vector<16x512xf32>
    %10 = arith.maximumf %8, %9 : vector<16x512xf32>
    %c0_9 = arith.constant 0 : index
    %c0_10 = arith.constant 0 : index
    %c0_11 = arith.constant 0 : index
    %11 = vector.load %arg5[%c0_9, %c0_10, %c0_11] : memref<1x4x16xf32, #tpu.memory_space<vmem>>, vector<1x4x16xf32>
    %12 = vector.shape_cast %11 : vector<1x4x16xf32> to vector<4x16xf32>
    %cst_12 = arith.constant dense<0.000000e+00> : vector<4x512xf32>
    %13 = tpu.matmul %12, %10, %cst_12 {dimension_numbers = #tpu.dot_dimension_numbers<[1], [0], [0], [1], [0, 0, 1, 1], [], []>} : vector<4x16xf32>, vector<16x512xf32>, vector<4x512xf32> -> vector<4x512xf32>
    %c0_13 = arith.constant 0 : index
    %c0_14 = arith.constant 0 : index
    %c0_15 = arith.constant 0 : index
    %14 = vector.load %arg6[%c0_13, %c0_14, %c0_15] : memref<1x4x1xf32, #tpu.memory_space<vmem>>, vector<1x4x1xf32>
    %15 = vector.shape_cast %14 : vector<1x4x1xf32> to vector<4x1xf32>
    %16 = vector.broadcast %15 : vector<4x1xf32> to vector<4x512xf32>
    %17 = arith.addf %13, %16 : vector<4x512xf32>
    %c0_16 = arith.constant 0 : index
    %c0_17 = arith.constant 0 : index
    %c0_18 = arith.constant 0 : index
    %18 = vector.load %arg7[%c0_16, %c0_17, %c0_18] : memref<1x4x512xf32, #tpu.memory_space<vmem>>, vector<1x4x512xf32>
    %19 = vector.shape_cast %18 : vector<1x4x512xf32> to vector<4x512xf32>
    %20 = vector.shape_cast %17 : vector<4x512xf32> to vector<1x4x512xf32>
    tpu.vector_store %arg7[%c0_16, %c0_17, %c0_18], %20 {strides = array<i32>} : memref<1x4x512xf32, #tpu.memory_space<vmem>>, vector<1x4x512xf32>,
    return
  }
  func.func @transform_0(%arg0: i32, %arg1: i32) -> (i32, i32, i32) {
    %c0_i32 = arith.constant 0 : i32
    %c0_i32_0 = arith.constant 0 : i32
    return %arg0, %c0_i32, %arg1 : i32, i32, i32
  }
  func.func @transform_1(%arg0: i32, %arg1: i32) -> (i32, i32, i32) {
    %c0_i32 = arith.constant 0 : i32
    %c0_i32_0 = arith.constant 0 : i32
    %c0_i32_1 = arith.constant 0 : i32
    return %arg0, %c0_i32, %c0_i32_0 : i32, i32, i32
  }
  func.func @transform_2(%arg0: i32, %arg1: i32) -> (i32, i32, i32) {
    %c0_i32 = arith.constant 0 : i32
    %c0_i32_0 = arith.constant 0 : i32
    %c0_i32_1 = arith.constant 0 : i32
    return %arg0, %c0_i32, %c0_i32_0 : i32, i32, i32
  }
  func.func @transform_3(%arg0: i32, %arg1: i32) -> (i32, i32, i32) {
    %c0_i32 = arith.constant 0 : i32
    %c0_i32_0 = arith.constant 0 : i32
    %c0_i32_1 = arith.constant 0 : i32
    return %arg0, %c0_i32, %c0_i32_0 : i32, i32, i32
  }
  func.func @transform_4(%arg0: i32, %arg1: i32) -> (i32, i32, i32) {
    %c0_i32 = arith.constant 0 : i32
    %c0_i32_0 = arith.constant 0 : i32
    %c0_i32_1 = arith.constant 0 : i32
    return %arg0, %c0_i32, %c0_i32_0 : i32, i32, i32
  }
  func.func @transform_5(%arg0: i32, %arg1: i32) -> (i32, i32, i32) {
    %c0_i32 = arith.constant 0 : i32
    %c0_i32_0 = arith.constant 0 : i32
    return %arg0, %c0_i32, %arg1 : i32, i32, i32
  }
}

module attributes {stable_mosaic.version = 11 : i64} {
  func.func @_mlp2_kernel(%arg0: i32, %arg1: memref<16x512xf32, #tpu.memory_space<vmem>>, %arg2: memref<16x16xf32, #tpu.memory_space<vmem>>, %arg3: memref<16x1xf32, #tpu.memory_space<vmem>>, %arg4: memref<4x16xf32, #tpu.memory_space<vmem>>, %arg5: memref<4x1xf32, #tpu.memory_space<vmem>>, %arg6: memref<4x512xf32, #tpu.memory_space<vmem>>) attributes {dimension_semantics = [#tpu.dimension_semantics<parallel>], iteration_bounds = array<i64: 1>, scalar_prefetch = 0 : i64, scratch_operands = 0 : i64, tpu.core_type = #tpu.core_type<tc>, window_params = [{transform_indices = @transform_0, window_bounds = array<i64: 16, 512>}, {pipeline_mode = #tpu.pipeline_mode<synchronous>, transform_indices = @transform_1, window_bounds = array<i64: 16, 16>}, {pipeline_mode = #tpu.pipeline_mode<synchronous>, transform_indices = @transform_2, window_bounds = array<i64: 16, 1>}, {pipeline_mode = #tpu.pipeline_mode<synchronous>, transform_indices = @transform_3, window_bounds = array<i64: 4, 16>}, {pipeline_mode = #tpu.pipeline_mode<synchronous>, transform_indices = @transform_4, window_bounds = array<i64: 4, 1>}, {transform_indices = @transform_5, window_bounds = array<i64: 4, 512>}]} {
    %c0 = arith.constant 0 : index
    %c0_0 = arith.constant 0 : index
    %0 = vector.load %arg2[%c0, %c0_0] : memref<16x16xf32, #tpu.memory_space<vmem>>, vector<16x16xf32>
    %c0_1 = arith.constant 0 : index
    %c0_2 = arith.constant 0 : index
    %1 = vector.load %arg1[%c0_1, %c0_2] : memref<16x512xf32, #tpu.memory_space<vmem>>, vector<16x512xf32>
    %cst = arith.constant dense<0.000000e+00> : vector<16x512xf32>
    %2 = tpu.matmul %0, %1, %cst {dimension_numbers = #tpu.dot_dimension_numbers<[1], [0], [0], [1], [0, 0, 1, 1], [], []>} : vector<16x16xf32>, vector<16x512xf32>, vector<16x512xf32> -> vector<16x512xf32>
    %c0_3 = arith.constant 0 : index
    %c0_4 = arith.constant 0 : index
    %3 = vector.load %arg3[%c0_3, %c0_4] : memref<16x1xf32, #tpu.memory_space<vmem>>, vector<16x1xf32>
    %4 = vector.broadcast %3 : vector<16x1xf32> to vector<16x512xf32>
    %5 = arith.addf %2, %4 : vector<16x512xf32>
    %cst_5 = arith.constant 0.000000e+00 : f32
    %6 = vector.broadcast %cst_5 : f32 to vector<16x512xf32>
    %7 = arith.maximumf %5, %6 : vector<16x512xf32>
    %c0_6 = arith.constant 0 : index
    %c0_7 = arith.constant 0 : index
    %8 = vector.load %arg4[%c0_6, %c0_7] : memref<4x16xf32, #tpu.memory_space<vmem>>, vector<4x16xf32>
    %cst_8 = arith.constant dense<0.000000e+00> : vector<4x512xf32>
    %9 = tpu.matmul %8, %7, %cst_8 {dimension_numbers = #tpu.dot_dimension_numbers<[1], [0], [0], [1], [0, 0, 1, 1], [], []>} : vector<4x16xf32>, vector<16x512xf32>, vector<4x512xf32> -> vector<4x512xf32>
    %c0_9 = arith.constant 0 : index
    %c0_10 = arith.constant 0 : index
    %10 = vector.load %arg5[%c0_9, %c0_10] : memref<4x1xf32, #tpu.memory_space<vmem>>, vector<4x1xf32>
    %11 = vector.broadcast %10 : vector<4x1xf32> to vector<4x512xf32>
    %12 = arith.addf %9, %11 : vector<4x512xf32>
    %c0_11 = arith.constant 0 : index
    %c0_12 = arith.constant 0 : index
    %13 = vector.load %arg6[%c0_11, %c0_12] : memref<4x512xf32, #tpu.memory_space<vmem>>, vector<4x512xf32>
    tpu.vector_store %arg6[%c0_11, %c0_12], %12 {strides = array<i32>} : memref<4x512xf32, #tpu.memory_space<vmem>>, vector<4x512xf32>,
    return
  }
  func.func @transform_0(%arg0: i32) -> (i32, i32) {
    %c0_i32 = arith.constant 0 : i32
    %c0_i32_0 = arith.constant 0 : i32
    return %c0_i32, %arg0 : i32, i32
  }
  func.func @transform_1(%arg0: i32) -> (i32, i32) {
    %c0_i32 = arith.constant 0 : i32
    %c0_i32_0 = arith.constant 0 : i32
    %c0_i32_1 = arith.constant 0 : i32
    return %c0_i32, %c0_i32_0 : i32, i32
  }
  func.func @transform_2(%arg0: i32) -> (i32, i32) {
    %c0_i32 = arith.constant 0 : i32
    %c0_i32_0 = arith.constant 0 : i32
    %c0_i32_1 = arith.constant 0 : i32
    return %c0_i32, %c0_i32_0 : i32, i32
  }
  func.func @transform_3(%arg0: i32) -> (i32, i32) {
    %c0_i32 = arith.constant 0 : i32
    %c0_i32_0 = arith.constant 0 : i32
    %c0_i32_1 = arith.constant 0 : i32
    return %c0_i32, %c0_i32_0 : i32, i32
  }
  func.func @transform_4(%arg0: i32) -> (i32, i32) {
    %c0_i32 = arith.constant 0 : i32
    %c0_i32_0 = arith.constant 0 : i32
    %c0_i32_1 = arith.constant 0 : i32
    return %c0_i32, %c0_i32_0 : i32, i32
  }
  func.func @transform_5(%arg0: i32) -> (i32, i32) {
    %c0_i32 = arith.constant 0 : i32
    %c0_i32_0 = arith.constant 0 : i32
    return %c0_i32, %arg0 : i32, i32
  }
}

</mosaic_0001>

<bundles_post_ra>
// kernel: vq_model_forward.5
= control target key start
LH: loop header
LB: loop body
LE: loop exit
PB: predicated region body
PF: predicated region fallthrough
CT: control target
= control target key end

     0   :  { %s942_s18 = smov 0   ;;  %s944_s19 = smov 0   ;;  %s1005_s0 = inlined_call_operand.vmem [shape: f32[2,8,512], index: 0, kind: input, shape index: {}]   ;;  %s1006_s1 = inlined_call_operand.vmem [shape: f32[2,16,8], index: 1, kind: input, shape index: {}]   ;;  %s1007_s2 = inlined_call_operand.vmem [shape: f32[2,16,1], index: 2, kind: input, shape index: {}]   ;;  %s1008_s3 = inlined_call_operand.vmem [shape: f32[2,4,16], index: 3, kind: input, shape index: {}]   ;;  %s1009_s4 = inlined_call_operand.vmem [shape: f32[2,4,1], index: 4, kind: input, shape index: {}]   ;;  %s1010_s5 = inlined_call_operand.vmem [shape: f32[2,4,512], index: 5, kind: output, shape index: {}]  }
   0x1   :  { %s946_s20 = smov 0  }
   0x2 LB: > { %s27_s21 = sadd.s32 1, %s904_s19  ;;  %p827_p0 = scmp.ge.s32.totalorder %s908_s20, 1  ;;  %s908_s20 = sphi %s946_s20, %s15_s20   ;;  %s904_s19 = sphi %s944_s19, %s1012_s19   ;;  %s900_s18 = sphi %s942_s18, %s1011_s18  }
   0x3   : > { %p29_p1 = scmp.ge.s32.totalorder %s27_s21, 2  ;;  %p246_p2 = scmp.lt.s32.totalorder %s908_s20, 3 }
   0x5   : > { %s1014_s21 = smov (%p29_p1, %s27_s21), 0  ;;  %p247_p3 = pnand %p827_p0, %p246_p2 }
   0x6   : > { %p301_p4 = scmp.lt.s32.totalorder (!%p247_p3), %s900_s18, 1  ;;  %v910_v0 = vmov (!%p247_p3), 0.0   ;;  %v911_v1 = vmov (!%p247_p3), 0   ;;  %vm356_vm0 = vcmask (!%p247_p3), 64512   ;;  %vm532_vm1 = vcmask (!%p247_p3), 130048  }
   0x7   : > { %250 = sbr.rel (%p247_p3) target bundleno = 465 (0x1d1), region = 40  ;;  %427 = vmatprep.mubr.f32.mxu0 (!%p247_p3), %v910_v0  ;;  %504 = vmatprep.mubr.f32.mxu1 (!%p247_p3), %v910_v0 }
   0x8   : > { %884 = vset.pattern.permute.xlu0 (!%p247_p3), %v911_v1  ;;  %885 = vset.pattern.permute.xlu1 (!%p247_p3), %v911_v1 }
   0xe   : > { %s1016_s18 = smov (!%p301_p4, %s900_s18), 1 }
   0xf   : > { %s846_s22 = sshll.u32 %s1016_s18, 5  ;;  %s964_s23 = sshll.u32 %s1016_s18, 4 }
  0x10   : > { %s308_s26 = scalar_lea.vmem %s1005_s0, %s846_s22  ;;  %s314_s29 = scalar_lea.vmem %s1006_s1, %s964_s23 }
  0x11   : > { %v341_v2 = vld [vmem:[%s308_s26 + $0x8] sm:$0xff]  ;;  %v343_v3 = vld [vmem:[%s308_s26 + $0x18] sm:$0xff]  ;;  %v340_v4 = vld [vmem:[%s308_s26] sm:$0xff]  ;;  %s319_s7 = scalar_lea.vmem %s1007_s2, %s964_s23  ;;  %s834_s8 = sshll.u32 %s1016_s18, 2 }
  0x12   : > { %363 = vmatprep.subr.mxu0 %v341_v2  ;;  %440 = vmatprep.subr.mxu1 %v343_v3  ;;  %v342_v5 = vld [vmem:[%s308_s26 + $0x10] sm:$0xff]  ;;  %v338_v6 = vld [vmem:[%s314_s29] sm:$0xff]  ;;  %v339_v8 = vld [vmem:[%s314_s29 + $0x8] sm:$0xff]  ;;  %s327_s11 = scalar_lea.vmem %s1009_s4, %s834_s8  ;;  %s323_s14 = scalar_lea.vmem %s1008_s3, %s834_s8 }
  0x13   : > { %364 = vmatpush1.msra.mxu0 %v340_v4  ;;  %441 = vmatpush1.msra.mxu1 %v342_v5  ;;  %v344_v7 = vld [vmem:[%s319_s7] sm:$0xff]  ;;  %v345_v9 = vld [vmem:[%s319_s7 + $0x8] sm:$0xff]  ;;  %s336_s17 = scalar_lea.vmem %s1010_s5, %s964_s23 }
  0x14   : > { %838 = vmatmul.mubr.msk.f32.vlgmr.msra.gmra.mrb[0].mxu0 %vm356_vm0, %v338_v6  ;;  %840 = vmatmul.mubr.msk.f32.vlgmr.msra.gmra.mrb[0].mxu1 %vm356_vm0, %v338_v6  ;;  %v526_v10 = vld [vmem:[%s327_s11] sm:$0xf] }
  0x15   : > { %433 = vmatprep.mubr.f32.mxu0 %v910_v0  ;;  %510 = vmatprep.mubr.f32.mxu1 %v910_v0  ;;  %v525_v41 = vld [vmem:[%s323_s14] sm:$0xf] }
  0x16   : > { %348 = vperm.xlu0 %884, %v344_v7   ;;  %529 = vperm.xlu1 %885, %v526_v10  }
  0x18   : > { %839 = vmatmul.mubr.msk.f32.gmra.mrb[2].mxu0 %vm356_vm0, %v339_v8  ;;  %841 = vmatmul.mubr.msk.f32.gmra.mrb[2].mxu1 %vm356_vm0, %v339_v8 }
  0x19   : > { %600 = vmatprep.mubr.f32.mxu0 %v910_v0  ;;  %671 = vmatprep.mubr.f32.mxu1 %v910_v0 }
  0x1a   : > { %353 = vperm.xlu0 %884, %v345_v9  }
  0x95   : > { %v349_v11 = vpop.permute.xlu0 %348  ;;  %v530_v42 = vpop.permute.xlu1 %529 }
  0x99   : > { %v354_v18 = vpop.permute.xlu0 %353 }
  0xe7   : > { %v429_v12 = vpop.f32.mrb[0].mxu0  ;;  %v506_v13 = vpop.f32.mrb[0].mxu1 }
  0xe8   : > { %v431_v14 = vpop.f32.mrb[1].mxu0  ;;  %v508_v15 = vpop.f32.mrb[1].mxu1  ;;  %v430_v16 = vadd.f32 %v429_v12, %v349_v11  ;;  %v507_v17 = vadd.f32 %v506_v13, %v349_v11 }
  0xe9   : > { %v432_v19 = vadd.f32 %v431_v14, %v349_v11  ;;  %v509_v20 = vadd.f32 %v508_v15, %v349_v11 }
  0xea   : > { %v517_v29 = vmax.f32 %v430_v16, 0.0  ;;  %v519_v30 = vmax.f32 %v507_v17, 0.0 }
  0xeb   : > { %v435_v21 = vpop.f32.mrb[2].mxu0  ;;  %v512_v22 = vpop.f32.mrb[2].mxu1  ;;  %v518_v33 = vmax.f32 %v432_v19, 0.0  ;;  %v520_v34 = vmax.f32 %v509_v20, 0.0 }
  0xec   : > { %v436_v23 = vadd.f32 %v435_v21, %v354_v18  ;;  %v513_v24 = vadd.f32 %v512_v22, %v354_v18  ;;  %v437_v25 = vpop.f32.mrb[3].mxu0  ;;  %v514_v26 = vpop.f32.mrb[3].mxu1 }
  0xed   : > { %v438_v27 = vadd.f32 %v437_v25, %v354_v18  ;;  %v515_v28 = vadd.f32 %v514_v26, %v354_v18 }
  0xee   : > { %v521_v31 = vmax.f32 %v436_v23, 0.0  ;;  %v523_v32 = vmax.f32 %v513_v24, 0.0 }
  0xef   : > { %v522_v35 = vmax.f32 %v438_v27, 0.0  ;;  %v524_v36 = vmax.f32 %v515_v28, 0.0 }
  0xf0   : > { %v852_v37 = vpack.c.bf16 %v521_v31, %v517_v29  ;;  %v856_v38 = vpack.c.bf16 %v523_v32, %v519_v30 }
  0xf1   : > { %v850_v39 = vpack.c.bf16 %v522_v35, %v518_v33  ;;  %v854_v40 = vpack.c.bf16 %v524_v36, %v520_v34 }
  0xf3   : > { %851 = vmatprep.subr.bf16.mxu0 %v850_v39  ;;  %855 = vmatprep.subr.bf16.mxu1 %v854_v40 }
  0xf4   : > { %853 = vmatpush1.bf16.msra.mxu0 %v852_v37  ;;  %857 = vmatpush1.bf16.msra.mxu1 %v856_v38 }
  0xf7   : > { %842 = vmatmul.mubr.msk.f32.vlgmr.msra.gmra.mrb[4].mxu0 %vm532_vm1, %v525_v41  ;;  %843 = vmatmul.mubr.msk.f32.vlgmr.msra.gmra.mrb[4].mxu1 %vm532_vm1, %v525_v41 }
 0x1ca   : > { %v602_v43 = vpop.f32.mrb[4].mxu0  ;;  %v673_v44 = vpop.f32.mrb[4].mxu1 }
 0x1cb   : > { %v603_v45 = vadd.f32 %v602_v43, %v530_v42  ;;  %v674_v46 = vadd.f32 %v673_v44, %v530_v42  ;;  %v604_v47 = vpop.f32.mrb[5].mxu0  ;;  %v675_v48 = vpop.f32.mrb[5].mxu1 }
 0x1cc   : > { %v605_v49 = vadd.f32 %v604_v47, %v530_v42  ;;  %v676_v50 = vadd.f32 %v675_v48, %v530_v42 }
 0x1ce   : > { %v682_v51 = vcombine.low %v603_v45, %v605_v49  ;;  %v683_v52 = vcombine.low %v674_v46, %v676_v50 }
 0x1d0   : > { %686 = vst [vmem:[%s336_s17] sm:$0xff] %v682_v51  ;;  %687 = vst [vmem:[%s336_s17 + $0x8] sm:$0xff] %v683_v52 }
 0x1d1 PF: > { %s15_s20 = sadd.s32 1, %s908_s20   ;;  %s1011_s18 = smov %s904_s19 }
 0x1d2   : > { %p12_p5 = scmp.ge.s32.totalorder %s15_s20, 4   ;;  %s1012_s19 = smov %s1014_s21 }
 0x1d4   :  { %14 = sbr.rel (!%p12_p5) target bundleno = 2 (0x2), region = 82 }

// kernel: vq_model_forward.3
= control target key start
LH: loop header
LB: loop body
LE: loop exit
PB: predicated region body
PF: predicated region fallthrough
CT: control target
= control target key end

     0   :  { %s2026_s27 = smov 0   ;;  %s2028_s28 = smov 0   ;;  %s2373_s0 = inlined_call_operand.vmem [shape: f32[4,3,1024], index: 0, kind: input, shape index: {}]   ;;  %s2374_s1 = inlined_call_operand.vmem [shape: f32[8,3], index: 1, kind: input, shape index: {}]   ;;  %s2375_s2 = inlined_call_operand.vmem [shape: f32[8,1], index: 2, kind: input, shape index: {}]   ;;  %s2376_s3 = inlined_call_operand.vmem [shape: f32[8,8], index: 3, kind: input, shape index: {}]   ;;  %s2377_s4 = inlined_call_operand.vmem [shape: f32[8,1], index: 4, kind: input, shape index: {}]   ;;  %s2378_s5 = inlined_call_operand.vmem [shape: f32[1,8], index: 5, kind: input, shape index: {}]   ;;  %s2379_s6 = inlined_call_operand.vmem [shape: f32[4,8,1024], index: 6, kind: output, shape index: {0}]   ;;  %s2380_s7 = inlined_call_operand.vmem [shape: s32[4,1,1024], index: 7, kind: output, shape index: {1}]   ;;  %s2381_s8 = inlined_call_operand.vmem [shape: f32[8,512], index: 8, kind: output, shape index: {2}]  }
   0x1   :  { %s2030_s29 = smov 0  }
   0x2 LB: > { %s31_s30 = sadd.s32 1, %s1971_s28  ;;  %p1821_p0 = scmp.ge.s32.totalorder %s1975_s29, 1  ;;  %s1975_s29 = sphi %s2030_s29, %s19_s29   ;;  %s1971_s28 = sphi %s2028_s28, %s2399_s28   ;;  %s1967_s27 = sphi %s2026_s27, %s2398_s27  }
   0x3   : > { %p33_p1 = scmp.ge.s32.totalorder %s31_s30, 4  ;;  %p292_p2 = scmp.lt.s32.totalorder %s1975_s29, 5 }
   0x5   : > { %s2401_s30 = smov (%p33_p1, %s31_s30), 0  ;;  %p293_p3 = pnand %p1821_p0, %p292_p2 }
   0x6   : > { %p348_p4 = scmp.lt.s32.totalorder (!%p293_p3), %s1967_s27, 3  ;;  %v1977_v0 = vmov (!%p293_p3), 0.0   ;;  %v387_v1 = vld [vmem:[%s2375_s2] sm:$0xff] (!%p293_p3)  ;;  %v1978_v2 = vmov (!%p293_p3), 0   ;;  %vm405_vm0 = vcmask (!%p293_p3), 1042432   ;;  %vm401_vm1 = vcmask (!%p293_p3), 23552  }
   0x7   : > { %296 = sbr.rel (%p293_p3) target bundleno = 735 (0x2df), region = 44  ;;  %486 = vmatprep.mubr.f32.mxu0 (!%p293_p3), %v1977_v0  ;;  %557 = vmatprep.mubr.f32.mxu1 (!%p293_p3), %v1977_v0  ;;  %v715_v3 = vld [vmem:[%s2377_s4] sm:$0xff] (!%p293_p3)  ;;  %vm721_vm2 = vcmask (!%p293_p3), 64512   ;;  %v1979_v49 = vmov (!%p293_p3), -1.0  }
   0x8   : > { %1900 = vset.pattern.permute.xlu0 (!%p293_p3), %v1978_v2  ;;  %v382_v10 = vld [vmem:[%s2374_s1] sm:$0xff] (!%p293_p3) }
   0x9   : > { %390 = vperm.xlu0 (!%p293_p3), %1900, %v387_v1   ;;  %v714_v32 = vld [vmem:[%s2376_s3] sm:$0xff] (!%p293_p3) }
   0xd   : > { %718 = vperm.xlu0 (!%p293_p3), %1900, %v715_v3  }
   0xe   : > { %s2403_s27 = smov (!%p348_p4, %s1967_s27), 3 }
   0xf   : > { %s1850_s11 = sshll.u32 %s2403_s27, 5  ;;  %s1851_s21 = sshll.u32 %s2403_s27, 6 }
  0x10   : > { %s355_s16 = scalar_lea.vmem %s2373_s0, %s1850_s11  ;;  %s2092_s24 = scalar_lea.vmem %s2379_s6, %s1851_s21 }
  0x11   : > { %v383_v4 = vld [vmem:[%s355_s16] sm:$0x77]  ;;  %v384_v5 = vld [vmem:[%s355_s16 + $0x8] sm:$0x77]  ;;  %v385_v6 = vld [vmem:[%s355_s16 + $0x10] sm:$0x77] }
  0x12   : > { %v397_v7 = vcombine.high %v383_v4, %v383_v4  ;;  %v398_v8 = vcombine.high %v384_v5, %v384_v5  ;;  %v386_v9 = vld [vmem:[%s355_s16 + $0x18] sm:$0x77]  ;;  %v399_v11 = vcombine.high %v385_v6, %v385_v6  ;;  %s1826_s9 = sshll.u32 %s2403_s27, 3 }
  0x13   : > { %v400_v12 = vcombine.high %v386_v9, %v386_v9  ;;  %s374_s12 = scalar_lea.vmem %s2380_s7, %s1826_s9  ;;  %s380_s16 = scalar_lea.vmem %s2381_s8, %s1826_s9 }
  0x14   : > { %1828 = vmatprep.subr.msk.mxu0 %vm405_vm0, %v397_v7  ;;  %1831 = vmatprep.subr.msk.mxu1 %vm405_vm0, %v398_v8 }
  0x15   : > { %1829 = vmatpush1.msk.msra.mxu0 %vm405_vm0, %v383_v4  ;;  %1832 = vmatpush1.msk.msra.mxu1 %vm405_vm0, %v384_v5 }
  0x16   : > { %1830 = vmatmul.mubr.msk.f32.vlgmr.msra.gmra.mrb[0].mxu0 %vm401_vm1, %v382_v10  ;;  %1833 = vmatmul.mubr.msk.f32.vlgmr.msra.gmra.mrb[0].mxu1 %vm401_vm1, %v382_v10 }
  0x17   : > { %1834 = vmatprep.subr.msk.mxu0 %vm405_vm0, %v399_v11  ;;  %1837 = vmatprep.subr.msk.mxu1 %vm405_vm0, %v400_v12 }
  0x18   : > { %1835 = vmatpush1.msk.msra.mxu0 %vm405_vm0, %v385_v6  ;;  %628 = vmatprep.mubr.f32.mxu0 %v1977_v0 }
  0x19   : > { %1838 = vmatpush1.msk.msra.mxu1 %vm405_vm0, %v386_v9  ;;  %699 = vmatprep.mubr.f32.mxu1 %v1977_v0 }
  0x1a   : > { %1836 = vmatmul.mubr.msk.f32.vlgmr.msra.gmra.mrb[2].mxu0 %vm401_vm1, %v382_v10  ;;  %1839 = vmatmul.mubr.msk.f32.vlgmr.msra.gmra.mrb[2].mxu1 %vm401_vm1, %v382_v10 }
  0x1b   : > { %789 = vmatprep.mubr.f32.mxu0 %v1977_v0  ;;  %860 = vmatprep.mubr.f32.mxu1 %v1977_v0 }
  0x88   : > { %v391_v13 = vpop.permute.xlu0 %390 }
  0x8c   : > { %v719_v39 = vpop.permute.xlu0 %718 }
  0xe9   : > { %v488_v14 = vpop.f32.mrb[0].mxu0  ;;  %v559_v15 = vpop.f32.mrb[0].mxu1 }
  0xea   : > { %v489_v16 = vadd.f32 %v488_v14, %v391_v13  ;;  %v560_v17 = vadd.f32 %v559_v15, %v391_v13  ;;  %v490_v18 = vpop.f32.mrb[1].mxu0  ;;  %v561_v19 = vpop.f32.mrb[1].mxu1 }
  0xeb   : > { %v491_v20 = vadd.f32 %v490_v18, %v391_v13  ;;  %v562_v21 = vadd.f32 %v561_v19, %v391_v13 }
  0xec   : > { %v708_v22 = vmax.f32 %v560_v17, 0.0  ;;  %v706_v27 = vmax.f32 %v489_v16, 0.0 }
  0xed   : > { %v707_v23 = vmax.f32 %v491_v20, 0.0  ;;  %v709_v24 = vmax.f32 %v562_v21, 0.0  ;;  %v630_v25 = vpop.f32.mrb[2].mxu0  ;;  %v701_v26 = vpop.f32.mrb[2].mxu1 }
  0xee   : > { %v631_v28 = vadd.f32 %v630_v25, %v391_v13  ;;  %v702_v29 = vadd.f32 %v701_v26, %v391_v13  ;;  %v632_v30 = vpop.f32.mrb[3].mxu0  ;;  %v703_v31 = vpop.f32.mrb[3].mxu1 }
  0xef   : > { %v633_v33 = vadd.f32 %v632_v30, %v391_v13  ;;  %v704_v34 = vadd.f32 %v703_v31, %v391_v13  ;;  %725 = vmatprep.subr.mxu0 %v707_v23  ;;  %796 = vmatprep.subr.mxu1 %v709_v24 }
  0xf0   : > { %726 = vmatpush1.msra.mxu0 %v706_v27  ;;  %797 = vmatpush1.msra.mxu1 %v708_v22  ;;  %v710_v37 = vmax.f32 %v631_v28, 0.0  ;;  %v712_v38 = vmax.f32 %v702_v29, 0.0 }
  0xf1   : > { %v711_v35 = vmax.f32 %v633_v33, 0.0  ;;  %v713_v36 = vmax.f32 %v704_v34, 0.0  ;;  %1840 = vmatmul.mubr.msk.f32.vlgmr.msra.gmra.mrb[4].mxu0 %vm721_vm2, %v714_v32  ;;  %1841 = vmatmul.mubr.msk.f32.vlgmr.msra.gmra.mrb[4].mxu1 %vm721_vm2, %v714_v32 }
  0xf2   : > { %931 = vmatprep.mubr.f32.mxu0 %v1977_v0  ;;  %1002 = vmatprep.mubr.f32.mxu1 %v1977_v0 }
  0xf3   : > { %867 = vmatprep.subr.mxu0 %v711_v35  ;;  %938 = vmatprep.subr.mxu1 %v713_v36 }
  0xf4   : > { %868 = vmatpush1.msra.mxu0 %v710_v37  ;;  %939 = vmatpush1.msra.mxu1 %v712_v38 }
  0xf5   : > { %1842 = vmatmul.mubr.msk.f32.vlgmr.msra.gmra.mrb[6].mxu0 %vm721_vm2, %v714_v32  ;;  %1843 = vmatmul.mubr.msk.f32.vlgmr.msra.gmra.mrb[6].mxu1 %vm721_vm2, %v714_v32 }
  0xf6   : > { %1117 = vmatprep.mubr.f32.mxu0 %v1977_v0  ;;  %1188 = vmatprep.mubr.f32.mxu1 %v1977_v0 }
 0x1c4   : > { %v791_v40 = vpop.f32.mrb[4].mxu0  ;;  %v862_v41 = vpop.f32.mrb[4].mxu1 }
 0x1c5   : > { %v792_v42 = vadd.f32 %v791_v40, %v719_v39  ;;  %v863_v43 = vadd.f32 %v862_v41, %v719_v39  ;;  %v793_v44 = vpop.f32.mrb[5].mxu0  ;;  %v864_v45 = vpop.f32.mrb[5].mxu1 }
 0x1c6   : > { %v794_v46 = vadd.f32 %v793_v44, %v719_v39  ;;  %v865_v57 = vadd.f32 %v864_v45, %v719_v39 }
 0x1c7   : > { %vm1009_vm3 = vcmp.gt.f32.partialorder %v792_v42, 0.0  ;;  %v2094_v47 = vmul.f32 4.0, %v792_v42  ;;  %vm1011_vm4 = vcmp.gt.f32.partialorder %v863_v43, 0.0  ;;  %v2096_v48 = vmul.f32 4.0, %v863_v43 }
 0x1c8   : > { %v2099_v50 = vsel %vm1009_vm3, 1.0, %v1979_v49  ;;  %v2102_v51 = vsel %vm1011_vm4, 1.0, %v1979_v49  ;;  %vm1010_vm5 = vcmp.gt.f32.partialorder %v794_v46, 0.0  ;;  %v2104_v52 = vmul.f32 4.0, %v794_v46  ;;  %v933_v53 = vpop.f32.mrb[6].mxu0  ;;  %v1004_v54 = vpop.f32.mrb[6].mxu1 }
 0x1c9   : > { %1025 = vst [vmem:[%s2092_s24] sm:$0xff] %v2099_v50  ;;  %v1403_v55 = vand.u32 2147483647, %v2094_v47  ;;  %v1579_v56 = vsub.f32 %v2099_v50, %v792_v42  ;;  %1027 = vst [vmem:[%s2092_s24 + $0x10] sm:$0xff] %v2102_v51  ;;  %v935_v58 = vpop.f32.mrb[7].mxu0  ;;  %v1006_v59 = vpop.f32.mrb[7].mxu1  ;;  %v1018_v62 = vsel %vm1010_vm5, 1.0, %v1979_v49  ;;  %v1581_v3 = vsub.f32 %v2102_v51, %v863_v43 }
 0x1ca   : > { %v1405_v60 = vand.u32 2147483647, %v2096_v48  ;;  %v1404_v63 = vand.u32 2147483647, %v2104_v52  ;;  %1026 = vst [vmem:[%s2092_s24 + $0x8] sm:$0xff] %v1018_v62  ;;  %v1580_v6 = vsub.f32 %v1018_v62, %v794_v46  ;;  %vm1012_vm6 = vcmp.gt.f32.partialorder %v865_v57, 0.0 }
 0x1cb   : > { %v1411_v61 = vsub.f32 0.0, %v1403_v55  ;;  %v1587_v1 = vmul.f32 %v1579_v56, %v1579_v56  ;;  %v1020_v8 = vsel %vm1012_vm6, 1.0, %v1979_v49  ;;  %v2118_v9 = vmul.f32 4.0, %v865_v57 }
 0x1cc   : > { %v1413_v2 = vsub.f32 0.0, %v1405_v60  ;;  %v1412_v5 = vsub.f32 0.0, %v1404_v63  ;;  %v934_v10 = vadd.f32 %v933_v53, %v719_v39  ;;  %v1588_v12 = vmul.f32 %v1580_v6, %v1580_v6  ;;  %1028 = vst [vmem:[%s2092_s24 + $0x18] sm:$0xff] %v1020_v8 }
 0x1cd   : > { %v1419_v4 = vmul.f32 1.442695, %v1411_v61  ;;  %v1582_v13 = vsub.f32 %v1020_v8, %v865_v57  ;;  %v1406_v14 = vand.u32 2147483647, %v2118_v9  ;;  %v1589_v15 = vmul.f32 %v1581_v3, %v1581_v3 }
 0x1ce   : > { %v1423_v7 = vmul.f32 1.442695, %v1413_v2  ;;  %v1421_v11 = vmul.f32 1.442695, %v1412_v5  ;;  %vm1013_vm7 = vcmp.gt.f32.partialorder %v934_v10, 0.0  ;;  %v1611_v16 = vadd.f32 %v1588_v12, %v1587_v1 }
 0x1cf   : > { %1905 = vpow2.f32 %v1419_v4  ;;  %v2123_v17 = vsel %vm1013_vm7, 1.0, %v1979_v49  ;;  %v1414_v18 = vsub.f32 0.0, %v1406_v14  ;;  %v2127_v19 = vmul.f32 4.0, %v934_v10 }
 0x1d0   : > { %1907 = vpow2.f32 %v1421_v11  ;;  %1029 = vst [vmem:[%s2092_s24 + $0x20] sm:$0xff] %v2123_v17  ;;  %v2129_v20 = vadd.f32 %v1004_v54, %v719_v39  ;;  %v1590_v21 = vmul.f32 %v1582_v13, %v1582_v13  ;;  %v1612_v22 = vadd.f32 %v1611_v16, %v1589_v15 }
 0x1d1   : > { %1909 = vpow2.f32 %v1423_v7  ;;  %v936_v23 = vadd.f32 %v935_v58, %v719_v39  ;;  %v2131_v24 = vadd.f32 %v1006_v59, %v719_v39  ;;  %v1425_v25 = vmul.f32 1.442695, %v1414_v18 }
 0x1d2   : > { %v1407_v26 = vand.u32 2147483647, %v2127_v19  ;;  %vm1015_vm8 = vcmp.gt.f32.partialorder %v2129_v20, 0.0  ;;  %v1034_v27 = vadd.f32 1.0, %v1018_v62  ;;  %v2135_v28 = vadd.f32 %v1612_v22, %v1590_v21 }
 0x1d3   : > { %v2138_v29 = vsel %vm1015_vm8, 1.0, %v1979_v49  ;;  %v2141_v30 = vmul.f32 4.0, %v2129_v20  ;;  %vm1014_vm9 = vcmp.gt.f32.partialorder %v936_v23, 0.0  ;;  %1911 = vpow2.f32 %v1425_v25 }
 0x1d4   : > { %v1415_v31 = vsub.f32 0.0, %v1407_v26  ;;  %1031 = vst [vmem:[%s2092_s24 + $0x30] sm:$0xff] %v2138_v29  ;;  %v1022_v32 = vsel %vm1014_vm9, 1.0, %v1979_v49  ;;  %v2148_v34 = vmul.f32 4.0, %v936_v23  ;;  %vm1016_vm10 = vcmp.gt.f32.partialorder %v2131_v24, 0.0 }
 0x1d5   : > { %v1409_v33 = vand.u32 2147483647, %v2141_v30  ;;  %1030 = vst [vmem:[%s2092_s24 + $0x28] sm:$0xff] %v1022_v32  ;;  %v2152_v36 = vsel %vm1016_vm10, 1.0, %v1979_v49  ;;  %v2155_v37 = vmul.f32 4.0, %v2131_v24  ;;  %v1042_v38 = vmul.f32 0.5, %v1034_v27 }
 0x1d6   : > { %v1427_v35 = vmul.f32 1.442695, %v1415_v31  ;;  %v1408_v41 = vand.u32 2147483647, %v2148_v34  ;;  %1032 = vst [vmem:[%s2092_s24 + $0x38] sm:$0xff] %v2152_v36  ;;  %v1036_v42 = vadd.f32 1.0, %v1020_v8  ;;  %v1583_v59 = vsub.f32 %v2123_v17, %v934_v10 }
 0x1d7   : > { %v1417_v40 = vsub.f32 0.0, %v1409_v33  ;;  %1053 = vmatprep.subr.mxu0 %v1042_v38  ;;  %v1475_v45 = vmax.f32 %v2094_v47, 0.0  ;;  %v1410_v49 = vand.u32 2147483647, %v2155_v37  ;;  %v1477_v55 = vmax.f32 %v2096_v48, 0.0 }
 0x1d8   : > { %1913 = vpow2.f32 %v1427_v35  ;;  %v1416_v46 = vsub.f32 0.0, %v1408_v41  ;;  %v1044_v53 = vmul.f32 0.5, %v1036_v42  ;;  %v1584_v61 = vsub.f32 %v1022_v32, %v936_v23  ;;  %v1049_v8 = vld [vmem:[%s2378_s5] sm:$0x1] }
 0x1d9   : > { %v2157_v39 = vpop.eup %1905  ;;  %v1431_v57 = vmul.f32 1.442695, %v1417_v40  ;;  %v1418_v62 = vsub.f32 0.0, %v1410_v49  ;;  %v1033_v63 = vadd.f32 1.0, %v2099_v50  ;;  %v1035_v3 = vadd.f32 1.0, %v2102_v51 }
 0x1da   : > { %v1435_v43 = vadd.f32 1.0, %v2157_v39  ;;  %v2163_v44 = vpop.eup %1907  ;;  %v1486_v58 = vmul.f32 -0.5, %v2157_v39  ;;  %v1429_v60 = vmul.f32 1.442695, %v1416_v46  ;;  %1124 = vmatprep.subr.mxu1 %v1044_v53  ;;  %v1489_v1 = vand.u32 2147483647, %v2157_v39 }
 0x1db   : > { %v2167_v54 = vpop.eup %1909  ;;  %v1436_v56 = vadd.f32 1.0, %v2163_v44  ;;  %v1495_v2 = vmul.f32 -0.5, %v2163_v44  ;;  %vm1451_vm11 = vcmp.ge.f32.partialorder %v2094_v47, 0.0  ;;  %v1433_v5 = vmul.f32 1.442695, %v1418_v62 }
 0x1dc   : > { %1915 = vrcp.f32 %v1435_v43  ;;  %v1041_v6 = vmul.f32 0.5, %v1033_v63  ;;  %v1038_v7 = vadd.f32 1.0, %v1022_v32  ;;  %v1487_v50 = vadd.f32 1.0, %v1486_v58 }
 0x1dd   : > { %1917 = vlog2.f32 %v1435_v43  ;;  %v2177_v4 = vpop.eup %1911  ;;  %v1043_v10 = vmul.f32 0.5, %v1035_v3  ;;  %v1040_v11 = vadd.f32 1.0, %v2152_v36  ;;  %vm1452_vm12 = vcmp.ge.f32.partialorder %v2104_v52, 0.0 }
 0x1de   : > { %1919 = vrcp.f32 %v1436_v56  ;;  %1054 = vmatpush1.msra.mxu0 %v1041_v6  ;;  %v1046_v51 = vmul.f32 0.5, %v1038_v7  ;;  %v1037_v12 = vadd.f32 1.0, %v2123_v17  ;;  %v1039_v13 = vadd.f32 1.0, %v2138_v29 }
 0x1df   : > { %1921 = vlog2.f32 %v1436_v56  ;;  %v1498_v14 = vand.u32 2147483647, %v2163_v44  ;;  %1125 = vmatpush1.msra.mxu1 %v1043_v10  ;;  %v1048_v15 = vmul.f32 0.5, %v1040_v11  ;;  %1844 = vmatmul.mubr.msk.f32.vlgmr.msra.gmra.mrb[8].mxu0 %vm721_vm2, %v1049_v8  ;;  %v1437_v16 = vadd.f32 1.0, %v2167_v54 }
 0x1e0   : > { %1923 = vpow2.f32 %v1431_v57  ;;  %v1438_v18 = vadd.f32 1.0, %v2177_v4  ;;  %v1476_v22 = vmax.f32 %v2104_v52, 0.0  ;;  %v1496_v23 = vadd.f32 1.0, %v1495_v2  ;;  %1195 = vmatprep.subr.mxu0 %v1046_v51  ;;  %1845 = vmatmul.mubr.msk.f32.vlgmr.msra.gmra.mrb[8].mxu1 %vm721_vm2, %v1049_v8 }
 0x1e1   : > { %1925 = vpow2.f32 %v1429_v60  ;;  %v1045_v17 = vmul.f32 0.5, %v1037_v12  ;;  %v1047_v25 = vmul.f32 0.5, %v1039_v13  ;;  %v1478_v26 = vmax.f32 %v2118_v9, 0.0  ;;  %1266 = vmatprep.subr.mxu1 %v1048_v15  ;;  %1259 = vmatprep.mubr.f32.mxu0 %v1977_v0 }
 0x1e2   : > { %1927 = vpow2.f32 %v1433_v5  ;;  %v2191_v21 = vpop.eup %1913  ;;  %v2196_v27 = vmul.f32 %v1583_v59, %v1583_v59  ;;  %vm2200_vm13 = vcmp.lt.f32.partialorder %v1489_v1, 0.0004427343  ;;  %v2206_v35 = vsub.f32 %v2138_v29, %v2129_v20  ;;  %1330 = vmatprep.mubr.f32.mxu1 %v1977_v0 }
 0x1e3   : > { %v1439_v31 = vadd.f32 1.0, %v2191_v21  ;;  %1929 = vrcp.f32 %v1437_v16  ;;  %v2208_v38 = vmul.f32 %v1584_v61, %v1584_v61  ;;  %1196 = vmatpush1.msra.mxu0 %v1045_v17  ;;  %1267 = vmatpush1.msra.mxu1 %v1047_v25  ;;  %v1488_v42 = vmul.f32 %v2157_v39, %v1487_v50 }
 0x1e4   : > { %1931 = vrcp.f32 %v1438_v18  ;;  %vm2212_vm14 = vcmp.lt.f32.partialorder %v1498_v14, 0.0004427343  ;;  %1846 = vmatmul.mubr.msk.f32.vlgmr.msra.gmra.mrb[10].mxu0 %vm721_vm2, %v1049_v8  ;;  %v1497_v46 = vmul.f32 %v2163_v44, %v1496_v23  ;;  %1847 = vmatmul.mubr.msk.f32.vlgmr.msra.gmra.mrb[10].mxu1 %vm721_vm2, %v1049_v8  ;;  %v1504_v49 = vmul.f32 -0.5, %v2167_v54 }
 0x1e5   : > { %1933 = vrcp.f32 %v1439_v31  ;;  %vm1453_vm15 = vcmp.ge.f32.partialorder %v2096_v48, 0.0  ;;  %v1507_v56 = vand.u32 2147483647, %v2167_v54  ;;  %v1479_v59 = vmax.f32 %v2127_v19, 0.0 }
 0x1e6   : > { %v1916_v32 = vpop.eup %1915  ;;  %1935 = vlog2.f32 %v1437_v16  ;;  %v1480_v60 = vmax.f32 %v2148_v34, 0.0  ;;  %v1481_v61 = vmax.f32 %v2141_v30, 0.0  ;;  %vm1454_vm0 = vcmp.ge.f32.partialorder %v2118_v9, 0.0 }
 0x1e7   : > { %v1918_v40 = vpop.eup %1917  ;;  %v1459_v41 = vmul.f32 %v1916_v32, %v2157_v39  ;;  %1937 = vlog2.f32 %v1438_v18  ;;  %v1513_v2 = vmul.f32 -0.5, %v2177_v4  ;;  %vm1455_vm1 = vcmp.ge.f32.partialorder %v2127_v19, 0.0 }
 0x1e8   : > { %v1920_v20 = vpop.eup %1919  ;;  %v1485_v29 = vmul.f32 0.6931472, %v1918_v40  ;;  %v1482_v7 = vmax.f32 %v2155_v37, 0.0  ;;  %v1505_v8 = vadd.f32 1.0, %v1504_v49  ;;  %vm2249_vm2 = vcmp.lt.f32.partialorder %v1507_v56, 0.0004427343 }
 0x1e9   : > { %v1922_v53 = vpop.eup %1921  ;;  %v1467_v39 = vsel %vm1451_vm11, %v1916_v32, %v1459_v41  ;;  %v1460_v0 = vmul.f32 %v1920_v20, %v2163_v44  ;;  %v1522_v13 = vmul.f32 -0.5, %v2191_v21  ;;  %v1514_v15 = vadd.f32 1.0, %v1513_v2 }
 0x1ea   : > { %v2226_v57 = vpop.eup %1923  ;;  %v1494_v58 = vmul.f32 0.6931472, %v1922_v53  ;;  %v1491_v63 = vsel %vm2200_vm13, %v1488_v42, %v1485_v29  ;;  %v2246_v50 = vmul.f32 %v1467_v39, %v2094_v47  ;;  %v1516_v16 = vand.u32 2147483647, %v2177_v4 }
 0x1eb   : > { %v2231_v62 = vpop.eup %1925  ;;  %v1468_v44 = vsel %vm1452_vm12, %v1920_v20, %v1460_v0  ;;  %v1441_v1 = vadd.f32 1.0, %v2226_v57  ;;  %v2255_v51 = vadd.f32 %v1491_v63, %v1475_v45  ;;  %v1525_v18 = vand.u32 2147483647, %v2191_v21 }
 0x1ec   : > { %v2240_v3 = vpop.eup %1927  ;;  %v1440_v5 = vadd.f32 1.0, %v2231_v62  ;;  %v1627_v6 = vadd.f32 %v1468_v44, %v1467_v39  ;;  %v1500_v12 = vsel %vm2212_vm14, %v1497_v46, %v1494_v58  ;;  %v1523_v47 = vadd.f32 1.0, %v1522_v13 }
 0x1ed   : > { %v1442_v10 = vadd.f32 1.0, %v2240_v3  ;;  %1939 = vrcp.f32 %v1441_v1  ;;  %v1930_v14 = vpop.eup %1929  ;;  %v1531_v45 = vmul.f32 -0.5, %v2231_v62  ;;  %v1506_v33 = vmul.f32 %v2167_v54, %v1505_v8 }
 0x1ee   : > { %1941 = vrcp.f32 %v1440_v5  ;;  %v1932_v23 = vpop.eup %1931  ;;  %v1461_v17 = vmul.f32 %v1930_v14, %v2167_v54  ;;  %v1534_v40 = vand.u32 2147483647, %v2231_v62  ;;  %v1556_v42 = vadd.f32 %v1500_v12, %v1476_v22 }
 0x1ef   : > { %1943 = vrcp.f32 %v1442_v10  ;;  %v1934_v25 = vpop.eup %1933  ;;  %v1462_v32 = vmul.f32 %v1932_v23, %v2177_v4  ;;  %v1564_v43 = vmul.f32 %v1468_v44, %v2104_v52  ;;  %vm1456_vm3 = vcmp.ge.f32.partialorder %v2148_v34, 0.0 }
 0x1f0   : > { %1945 = vlog2.f32 %v1439_v31  ;;  %v1936_v41 = vpop.eup %1935  ;;  %v1463_v31 = vmul.f32 %v1934_v25, %v2191_v21  ;;  %v1469_v20 = vsel %vm1453_vm15, %v1930_v14, %v1461_v17  ;;  %vm1457_vm4 = vcmp.ge.f32.partialorder %v2141_v30, 0.0 }
 0x1f1   : > { %1947 = vlog2.f32 %v1440_v5  ;;  %v1938_v29 = vpop.eup %1937  ;;  %v1628_v54 = vadd.f32 %v1627_v6, %v1469_v20  ;;  %v1503_v46 = vmul.f32 0.6931472, %v1936_v41  ;;  %v1515_v49 = vmul.f32 %v2177_v4, %v1514_v15 }
 0x1f2   : > { %vm2276_vm5 = vcmp.lt.f32.partialorder %v1516_v16, 0.0004427343  ;;  %vm1458_vm6 = vcmp.ge.f32.partialorder %v2155_v37, 0.0  ;;  %v1470_v52 = vsel %vm1454_vm0, %v1932_v23, %v1462_v32  ;;  %v1512_v22 = vmul.f32 0.6931472, %v1938_v29 }
 0x1f3   : > { %v1524_v39 = vmul.f32 %v2191_v21, %v1523_v47  ;;  %vm2284_vm7 = vcmp.lt.f32.partialorder %v1525_v18, 0.0004427343  ;;  %v1532_v56 = vadd.f32 1.0, %v1531_v45  ;;  %v1471_v4 = vsel %vm1455_vm1, %v1934_v25, %v1463_v31 }
 0x1f4   : > { %v1629_v58 = vadd.f32 %v1628_v54, %v1470_v52  ;;  %vm2290_vm8 = vcmp.lt.f32.partialorder %v1534_v40, 0.0004427343  ;;  %1949 = vlog2.f32 %v1441_v1  ;;  %v1509_v44 = vsel %vm2249_vm2, %v1506_v33, %v1503_v46 }
 0x1f5   : > { %v1540_v2 = vmul.f32 -0.5, %v2226_v57  ;;  %v1543_v21 = vand.u32 2147483647, %v2226_v57  ;;  %1951 = vlog2.f32 %v1442_v10  ;;  %v1565_v6 = vmul.f32 %v1469_v20, %v2096_v48 }
 0x1f6   : > { %v1566_v8 = vmul.f32 %v1470_v52, %v2118_v9  ;;  %v1630_v12 = vadd.f32 %v1629_v58, %v1471_v4  ;;  %v1549_v13 = vmul.f32 -0.5, %v2240_v3  ;;  %v1518_v1 = vsel %vm2276_vm5, %v1515_v49, %v1512_v22 }
 0x1f7   : > { %v1940_v5 = vpop.eup %1939  ;;  %v1533_v11 = vmul.f32 %v2231_v62, %v1532_v56  ;;  %v1552_v16 = vand.u32 2147483647, %v2240_v3  ;;  %v1567_v23 = vmul.f32 %v1471_v4, %v2127_v19  ;;  %v1541_v17 = vadd.f32 1.0, %v1540_v2 }
 0x1f8   : > { %v1942_v14 = vpop.eup %1941  ;;  %v1465_v15 = vmul.f32 %v1940_v5, %v2226_v57  ;;  %v1557_v47 = vadd.f32 %v1509_v44, %v1477_v55  ;;  %vm2311_vm9 = vcmp.lt.f32.partialorder %v1543_v21, 0.0004427343  ;;  %v1571_v33 = vsub.f32 %v2255_v51, %v2246_v50 }
 0x1f9   : > { %v1944_v18 = vpop.eup %1943  ;;  %v1464_v10 = vmul.f32 %v1942_v14, %v2231_v62  ;;  %v1572_v40 = vsub.f32 %v1556_v42, %v1564_v43  ;;  %v1550_v20 = vadd.f32 1.0, %v1549_v13  ;;  %v1558_v48 = vadd.f32 %v1518_v1, %v1478_v26 }
 0x1fa   : > { %v1946_v45 = vpop.eup %1945  ;;  %v1466_v25 = vmul.f32 %v1944_v18, %v2240_v3  ;;  %v1473_v55 = vsel %vm1457_vm4, %v1940_v5, %v1465_v15  ;;  %vm2323_vm10 = vcmp.lt.f32.partialorder %v1552_v16, 0.0004427343  ;;  %v1542_v42 = vmul.f32 %v2226_v57, %v1541_v17 }
 0x1fb   : > { %v1948_v41 = vpop.eup %1947  ;;  %v1472_v62 = vsel %vm1456_vm3, %v1942_v14, %v1464_v10  ;;  %v1521_v31 = vmul.f32 0.6931472, %v1946_v45  ;;  %v1573_v43 = vsub.f32 %v1557_v47, %v1565_v6  ;;  %v1595_v53 = vadd.f32 %v1572_v40, %v1571_v33 }
 0x1fc   : > { %v1631_v29 = vadd.f32 %v1630_v12, %v1472_v62  ;;  %v1530_v54 = vmul.f32 0.6931472, %v1948_v41  ;;  %v1474_v50 = vsel %vm1458_vm6, %v1944_v18, %v1466_v25  ;;  %v1568_v22 = vmul.f32 %v1472_v62, %v2148_v34 }
 0x1fd   : > { %v1527_v51 = vsel %vm2284_vm7, %v1524_v39, %v1521_v31  ;;  %v1574_v56 = vsub.f32 %v1558_v48, %v1566_v8  ;;  %v1586_v4 = vsub.f32 %v2152_v36, %v2131_v24  ;;  %v1614_v39 = vadd.f32 %v2135_v28, %v2196_v27 }
 0x1fe   : > { %v1632_v9 = vadd.f32 %v1631_v29, %v1473_v55  ;;  %v1536_v26 = vsel %vm2290_vm8, %v1533_v11, %v1530_v54  ;;  %v1559_v49 = vadd.f32 %v1527_v51, %v1479_v59  ;;  %v1950_v52 = vpop.eup %1949  ;;  %v1596_v44 = vadd.f32 %v1595_v53, %v1573_v43 }
 0x1ff   : > { %v1952_v57 = vpop.eup %1951  ;;  %v1539_v58 = vmul.f32 0.6931472, %v1950_v52  ;;  %v1560_v63 = vadd.f32 %v1536_v26, %v1480_v60  ;;  %v1551_v59 = vmul.f32 %v2240_v3, %v1550_v20  ;;  %v1593_v2 = vmul.f32 %v2206_v35, %v2206_v35 }
 0x200   : > { %v1633_v0 = vadd.f32 %v1632_v9, %v1474_v50  ;;  %v1548_v19 = vmul.f32 0.6931472, %v1952_v57  ;;  %v1615_v21 = vadd.f32 %v1614_v39, %v2208_v38  ;;  %v1569_v24 = vmul.f32 %v1473_v55, %v2141_v30 }
 0x201   : > { %v1545_v28 = vsel %vm2311_vm9, %v1542_v42, %v1539_v58  ;;  %v1575_v36 = vsub.f32 %v1559_v49, %v1567_v23  ;;  %v1597_v27 = vadd.f32 %v1596_v44, %v1574_v56  ;;  %v1594_v3 = vmul.f32 %v1586_v4, %v1586_v4 }
 0x202   : > { %1634 = vadd.xlane.f32.xlu0 %v1633_v0  ;;  %v1554_v34 = vsel %vm2323_vm10, %v1551_v59, %v1548_v19  ;;  %v1561_v60 = vadd.f32 %v1545_v28, %v1481_v61  ;;  %v1616_v5 = vadd.f32 %v1615_v21, %v1593_v2  ;;  %v1570_v35 = vmul.f32 %v1474_v50, %v2155_v37 }
 0x203   : > { %v1562_v38 = vadd.f32 %v1554_v34, %v1482_v7  ;;  %v1576_v6 = vsub.f32 %v1560_v63, %v1568_v22  ;;  %v1598_v8 = vadd.f32 %v1597_v27, %v1575_v36  ;;  %v1980_v40 = vmov 1966171168  }
 0x204   : > { %v1617_v12 = vadd.f32 %v1616_v5, %v1594_v3  ;;  %v1577_v13 = vsub.f32 %v1561_v60, %v1569_v24  ;;  %v1350_v41 = vunpack.c.l.s4 %v1980_v40  ;;  %v1352_v62 = vlaneseq }
 0x205   : > { %v1599_v14 = vadd.f32 %v1598_v8, %v1576_v6  ;;  %v1578_v15 = vsub.f32 %v1562_v38, %v1570_v35 }
 0x206   : > { %v1351_v20 = vunpack.c.0.s8 %v1350_v41  ;;  %v1353_v48 = vshrl.u32 %v1352_v62, 7  ;;  %v1637_v8 = vand.u32 127, %v1352_v62 }
 0x207   : > { %v1600_v1 = vadd.f32 %v1599_v14, %v1577_v13 }
 0x208   : > { %v1354_v49 = vsub.s32 %v1351_v20, %v1353_v48  ;;  %vm1642_vm11 = vcmp.eq.s32.totalorder %v1637_v8, 1  ;;  %vm1643_vm12 = vcmp.eq.s32.totalorder %v1353_v48, 0  ;;  %vm1647_vm13 = vcmp.eq.s32.totalorder %v1637_v8, 2 }
 0x209   : > { %v1601_v11 = vadd.f32 %v1600_v1, %v1578_v15  ;;  %vm1640_vm14 = vcmp.eq.s32.totalorder %v1637_v8, 0  ;;  %vm1644_vm15 = vmand %vm1642_vm11, %vm1643_vm12 }
 0x20a   : > { %vm1648_vm0 = vmand %vm1647_vm13, %vm1643_vm12 }
 0x20b   : > { %1602 = vadd.xlane.f32.xlu1 %v1601_v11 }
 0x20f   : > { %1618 = vadd.xlane.f32.xlu1 %v1617_v12 }
 0x28f   : > { %v1635_v12 = vpop.xlane.xlu0 %1634 }
 0x290   : > { %v1641_v13 = vsel %vm1640_vm14, %v1635_v12, 0.0 }
 0x298   : > { %v1603_v16 = vpop.xlane.xlu1 %1602 }
 0x299   : > { %v1604_v30 = vrot.slane %v1603_v16, 4 }
 0x29b   : > { %v1605_v61 = vadd.f32 %v1604_v30, %v1603_v16 }
 0x29c   : > { %v1619_v18 = vpop.xlane.xlu1 %1618 }
 0x29d   : > { %v1606_v10 = vrot.slane %v1605_v61, 2  ;;  %v1620_v23 = vrot.slane %v1619_v18, 4 }
 0x29f   : > { %v1621_v17 = vadd.f32 %v1620_v23, %v1619_v18  ;;  %v1607_v47 = vadd.f32 %v1606_v10, %v1605_v61 }
 0x2a1   : > { %v1622_v37 = vrot.slane %v1621_v17, 2  ;;  %v1608_v7 = vrot.slane %v1607_v47, 1 }
 0x2a3   : > { %v1623_v45 = vadd.f32 %v1622_v37, %v1621_v17  ;;  %v1609_v25 = vadd.f32 %v1608_v7, %v1607_v47 }
 0x2a5   : > { %1868 = vpush %v1609_v25  ;;  %v1624_v32 = vrot.slane %v1623_v45, 1 }
 0x2a7   : > { %v1625_v33 = vadd.f32 %v1624_v32, %v1623_v45 }
 0x2a9   : > { %1870 = vpush %v1625_v33 }
 0x2b2   : > { %v1119_v31 = vpop.f32.mrb[8].mxu0 }
 0x2b3   : > { %v1852_v55 = vtrunc.f32 %v1119_v31  ;;  %v1190_v29 = vpop.f32.mrb[8].mxu1  ;;  %v1121_v54 = vpop.f32.mrb[9].mxu0 }
 0x2b4   : > { %v1856_v46 = vtrunc.f32 %v1190_v29  ;;  %v1854_v50 = vtrunc.f32 %v1121_v54  ;;  %v1192_v51 = vpop.f32.mrb[9].mxu1 }
 0x2b5   : > { %v1853_v42 = vcvt.f32.s32 %v1852_v55  ;;  %v1858_v43 = vtrunc.f32 %v1192_v51 }
 0x2b6   : > { %v1857_v9 = vcvt.f32.s32 %v1856_v46  ;;  %v1855_v26 = vcvt.f32.s32 %v1854_v50 }
 0x2b7   : > { %v1261_v53 = vpop.f32.mrb[10].mxu0  ;;  %v1859_v52 = vcvt.f32.s32 %v1858_v43  ;;  %v1332_v56 = vpop.f32.mrb[10].mxu1 }
 0x2b8   : > { %v1860_v22 = vtrunc.f32 %v1261_v53  ;;  %v1263_v4 = vpop.f32.mrb[11].mxu0  ;;  %v1345_v39 = vcombine.low %v1853_v42, %v1855_v26  ;;  %v1864_v57 = vtrunc.f32 %v1332_v56  ;;  %v1334_v58 = vpop.f32.mrb[11].mxu1 }
 0x2b9   : > { %v1862_v0 = vtrunc.f32 %v1263_v4  ;;  %v1346_v63 = vcombine.low %v1857_v9, %v1859_v52  ;;  %v1866_v19 = vtrunc.f32 %v1334_v58 }
 0x2ba   : > { %v1861_v44 = vcvt.f32.s32 %v1860_v22  ;;  %v1355_v59 = vrot.slane %v1345_v39, %v1354_v49  ;;  %v1865_v2 = vcvt.f32.s32 %v1864_v57 }
 0x2bb   : > { %v1863_v21 = vcvt.f32.s32 %v1862_v0  ;;  %v1362_v24 = vrot.slane %v1346_v63, %v1354_v49  ;;  %v1867_v28 = vcvt.f32.s32 %v1866_v19 }
 0x2bd   : > { %v1347_v36 = vcombine.low %v1861_v44, %v1863_v21  ;;  %v1377_v27 = vcombine.low %v1355_v59, %v1362_v24  ;;  %v1348_v34 = vcombine.low %v1865_v2, %v1867_v28 }
 0x2bf   : > { %v1369_v60 = vrot.slane %v1347_v36, %v1354_v49  ;;  %v1376_v3 = vrot.slane %v1348_v34, %v1354_v49  ;;  %v1385_v5 = vrot.slane %v1377_v27, %v1354_v49 }
 0x2c1   : > { %v1378_v35 = vcombine.low %v1369_v60, %v1376_v3 }
 0x2c3   : > { %v1392_v38 = vrot.slane %v1378_v35, %v1354_v49 }
 0x2c5   : > { %v1393_v6 = vcombine.low %v1385_v5, %v1392_v38 }
 0x2c7   : > { %1394 = vst [vmem:[%s374_s12] sm:$0xff] %v1393_v6 }
 0x2d6   : > { %s1869_s13 = spop %1868 }
 0x2d7   : > { %v1649_v15 = vstv %s1869_s13 }
 0x2da   : > { %s1871_s14 = spop %1870 }
 0x2db   : > { %v1645_v14 = vstv %s1871_s14 }
 0x2dc   : > { %v1646_v1 = vsel %vm1644_vm15, %v1645_v14, %v1641_v13 }
 0x2dd   : > { %v1650_v11 = vsel %vm1648_vm0, %v1649_v15, %v1646_v1 }
 0x2de   : > { %1651 = vst [vmem:[%s380_s16] sm:$0xff] %v1650_v11 }
 0x2df PF: > { %s19_s29 = sadd.s32 1, %s1975_s29   ;;  %s2398_s27 = smov %s1971_s28 }
 0x2e0   : > { %p16_p5 = scmp.ge.s32.totalorder %s19_s29, 6   ;;  %s2399_s28 = smov %s2401_s30 }
 0x2e2   :  { %18 = sbr.rel (!%p16_p5) target bundleno = 2 (0x2), region = 98 }

// kernel: vq_model_forward.4
= control target key start
LH: loop header
LB: loop body
LE: loop exit
PB: predicated region body
PF: predicated region fallthrough
CT: control target
= control target key end

     0   :  { %v403_v3 = vmov 0.0   ;;  %v404_v8 = vmov 0   ;;  %vm42_vm0 = vcmask 130048   ;;  %s489_s0 = inlined_call_operand.vmem [shape: f32[16,512], index: 0, kind: input, shape index: {}]   ;;  %s490_s2 = inlined_call_operand.vmem [shape: f32[16,1], index: 2, kind: input, shape index: {}]   ;;  %s491_s1 = inlined_call_operand.vmem [shape: f32[16,16], index: 1, kind: input, shape index: {}]   ;;  %s492_s4 = inlined_call_operand.vmem [shape: f32[4,1], index: 4, kind: input, shape index: {}]   ;;  %s493_s3 = inlined_call_operand.vmem [shape: f32[4,16], index: 3, kind: input, shape index: {}]   ;;  %s494_s5 = inlined_call_operand.vmem [shape: f32[4,512], index: 5, kind: output, shape index: {}]  }
   0x1   :  { %v23_v0 = vld [vmem:[%s489_s0 + $0x8] sm:$0xff]  ;;  %v25_v2 = vld [vmem:[%s489_s0 + $0x18] sm:$0xff]  ;;  %113 = vmatprep.mubr.f32.mxu0 %v403_v3  ;;  %190 = vmatprep.mubr.f32.mxu1 %v403_v3  ;;  %v22_v6 = vld [vmem:[%s489_s0] sm:$0xff] }
   0x2   :  { %v27_v1 = vld [vmem:[%s489_s0 + $0x28] sm:$0xff]  ;;  %v29_v5 = vld [vmem:[%s489_s0 + $0x38] sm:$0xff]  ;;  %v26_v7 = vld [vmem:[%s489_s0 + $0x20] sm:$0xff]  ;;  %401 = vset.pattern.permute.xlu0 %v404_v8  ;;  %402 = vset.pattern.permute.xlu1 %v404_v8 }
   0x3   :  { %v383_v4 = vpack.c.bf16 %v27_v1, %v23_v0  ;;  %v387_v9 = vpack.c.bf16 %v29_v5, %v25_v2  ;;  %v385_v10 = vpack.c.bf16 %v26_v7, %v22_v6  ;;  %v24_v11 = vld [vmem:[%s489_s0 + $0x10] sm:$0xff]  ;;  %v30_v14 = vld [vmem:[%s490_s2] sm:$0xff]  ;;  %v31_v16 = vld [vmem:[%s490_s2 + $0x8] sm:$0xff] }
   0x4   :  { %v28_v12 = vld [vmem:[%s489_s0 + $0x30] sm:$0xff]  ;;  %v20_v15 = vld [vmem:[%s491_s1] sm:$0xff]  ;;  %34 = vperm.xlu0 %401, %v30_v14   ;;  %v21_v17 = vld [vmem:[%s491_s1 + $0x8] sm:$0xff] }
   0x5   :  { %384 = vmatprep.subr.bf16.mxu0 %v383_v4  ;;  %v389_v13 = vpack.c.bf16 %v28_v12, %v24_v11  ;;  %388 = vmatprep.subr.bf16.mxu1 %v387_v9  ;;  %v212_v18 = vld [vmem:[%s492_s4] sm:$0xf] }
   0x6   :  { %386 = vmatpush1.bf16.msra.mxu0 %v385_v10  ;;  %215 = vperm.xlu1 %402, %v212_v18   ;;  %v211_v49 = vld [vmem:[%s493_s3] sm:$0xf] }
   0x7   :  { %390 = vmatpush1.bf16.msra.mxu1 %v389_v13 }
   0x8   :  { %39 = vperm.xlu0 %401, %v31_v16  }
   0x9   :  { %377 = vmatmul.mubr.msk.f32.vlgmr.msra.gmra.mrb[0].mxu0 %vm42_vm0, %v20_v15 }
   0xa   :  { %379 = vmatmul.mubr.msk.f32.vlgmr.msra.gmra.mrb[0].mxu1 %vm42_vm0, %v20_v15  ;;  %119 = vmatprep.mubr.f32.mxu0 %v403_v3 }
   0xb   :  { %196 = vmatprep.mubr.f32.mxu1 %v403_v3 }
   0xd   :  { %378 = vmatmul.mubr.msk.f32.gmra.mrb[2].mxu0 %vm42_vm0, %v21_v17 }
   0xe   :  { %380 = vmatmul.mubr.msk.f32.gmra.mrb[2].mxu1 %vm42_vm0, %v21_v17  ;;  %285 = vmatprep.mubr.f32.mxu0 %v403_v3 }
   0xf   :  { %356 = vmatprep.mubr.f32.mxu1 %v403_v3 }
  0x83   :  { %v35_v19 = vpop.permute.xlu0 %34 }
  0x85   :  { %v216_v50 = vpop.permute.xlu1 %215 }
  0x87   :  { %v40_v26 = vpop.permute.xlu0 %39 }
  0xdc   :  { %v115_v20 = vpop.f32.mrb[0].mxu0 }
  0xdd   :  { %v192_v21 = vpop.f32.mrb[0].mxu1  ;;  %v117_v22 = vpop.f32.mrb[1].mxu0  ;;  %v116_v24 = vadd.f32 %v115_v20, %v35_v19 }
  0xde   :  { %v194_v23 = vpop.f32.mrb[1].mxu1  ;;  %v193_v25 = vadd.f32 %v192_v21, %v35_v19  ;;  %v118_v27 = vadd.f32 %v117_v22, %v35_v19 }
  0xdf   :  { %v195_v29 = vadd.f32 %v194_v23, %v35_v19  ;;  %v203_v36 = vmax.f32 %v116_v24, 0.0 }
  0xe0   :  { %v121_v28 = vpop.f32.mrb[2].mxu0  ;;  %v205_v39 = vmax.f32 %v193_v25, 0.0  ;;  %v204_v40 = vmax.f32 %v118_v27, 0.0 }
  0xe1   :  { %v122_v30 = vadd.f32 %v121_v28, %v40_v26  ;;  %v198_v31 = vpop.f32.mrb[2].mxu1  ;;  %v123_v32 = vpop.f32.mrb[3].mxu0  ;;  %v206_v43 = vmax.f32 %v195_v29, 0.0 }
  0xe2   :  { %v199_v33 = vadd.f32 %v198_v31, %v40_v26  ;;  %v124_v34 = vadd.f32 %v123_v32, %v40_v26  ;;  %v200_v35 = vpop.f32.mrb[3].mxu1 }
  0xe3   :  { %v207_v37 = vmax.f32 %v122_v30, 0.0  ;;  %v201_v38 = vadd.f32 %v200_v35, %v40_v26 }
  0xe4   :  { %v209_v41 = vmax.f32 %v199_v33, 0.0  ;;  %v208_v42 = vmax.f32 %v124_v34, 0.0 }
  0xe5   :  { %v393_v44 = vpack.c.bf16 %v207_v37, %v203_v36  ;;  %v210_v45 = vmax.f32 %v201_v38, 0.0 }
  0xe6   :  { %v397_v46 = vpack.c.bf16 %v209_v41, %v205_v39  ;;  %v391_v47 = vpack.c.bf16 %v208_v42, %v204_v40 }
  0xe7   :  { %v395_v48 = vpack.c.bf16 %v210_v45, %v206_v43 }
  0xe8   :  { %392 = vmatprep.subr.bf16.mxu0 %v391_v47 }
  0xe9   :  { %396 = vmatprep.subr.bf16.mxu1 %v395_v48  ;;  %394 = vmatpush1.bf16.msra.mxu0 %v393_v44 }
  0xea   :  { %398 = vmatpush1.bf16.msra.mxu1 %v397_v46 }
  0xec   :  { %381 = vmatmul.mubr.msk.f32.vlgmr.msra.gmra.mrb[4].mxu0 %vm42_vm0, %v211_v49 }
  0xed   :  { %382 = vmatmul.mubr.msk.f32.vlgmr.msra.gmra.mrb[4].mxu1 %vm42_vm0, %v211_v49 }
 0x1bf   :  { %v287_v51 = vpop.f32.mrb[4].mxu0 }
 0x1c0   :  { %v358_v52 = vpop.f32.mrb[4].mxu1  ;;  %v288_v53 = vadd.f32 %v287_v51, %v216_v50  ;;  %v289_v54 = vpop.f32.mrb[5].mxu0 }
 0x1c1   :  { %v359_v55 = vadd.f32 %v358_v52, %v216_v50  ;;  %v290_v56 = vadd.f32 %v289_v54, %v216_v50  ;;  %v360_v57 = vpop.f32.mrb[5].mxu1 }
 0x1c2   :  { %v361_v58 = vadd.f32 %v360_v57, %v216_v50 }
 0x1c3   :  { %v367_v59 = vcombine.low %v288_v53, %v290_v56 }
 0x1c4   :  { %v368_v60 = vcombine.low %v359_v55, %v361_v58 }
 0x1c5   :  { %371 = vst [vmem:[%s494_s5] sm:$0xff] %v367_v59 }
 0x1c6   :  { %372 = vst [vmem:[%s494_s5 + $0x8] sm:$0xff] %v368_v60 }

</bundles_post_ra>
